<compile_context>
chip_gen: v7x
topology: tpu7x:2x2x1
jax: 0.10.0
libtpu: 0.0.40
codegen_flags: <defaults>
</compile_context>

<pallas_src>
import math

import jax
import jax.numpy as jnp
import numpy as np
from jax.experimental import pallas as pl
from jax.experimental.pallas import tpu as pltpu


def _round_up(x, m):
    return ((x + m - 1) // m) * m


def _largest_dividing_tile(total, cap):
    """Largest multiple of 128 that divides `total` and is <= cap (total % 128 == 0)."""
    best = 128
    t = 128
    while t <= min(cap, total):
        if total % t == 0:
            best = t
        t += 128
    return best


def _vmem_bytes(tm, d, tr, tn, multi_step):
    """Rough double-buffered VMEM footprint for one grid step."""
    total = 0
    total += 2 * tm * d * 2        # h tile, bf16, double buffered
    total += 2 * d * tr * 2        # feature weights (D, tr), bf16
    total += 2 * 8 * tr * 4        # feature bias (1, tr) -> 8 sublanes, f32
    total += 2 * tr * tn * 2       # output projection (tr, tn), bf16
    total += 2 * tm * tn * 4       # output tile, f32
    if multi_step:
        total += tm * tn * 4       # accumulator scratch
    return total


# ---------------------------------------------------------------------------
# Kernels
# ---------------------------------------------------------------------------
def _rfgp_kernel_single(x_ref, fw_ref, fb_ref, w2_ref, o_ref):
    """Single rank step: no accumulator needed, write the output tile directly.

    x_ref  : (tm, D)   bf16   input activations
    fw_ref : (D, Rp)   bf16   feature weights (transposed, -1/lengthscale folded in)
    fb_ref : (1, Rp)   f32    feature bias
    w2_ref : (Rp, tn)  bf16   output projection (transposed, feat scale folded in)
    o_ref  : (tm, tn)  f32    logits tile
    """
    pre = jnp.dot(x_ref[...], fw_ref[...], preferred_element_type=jnp.float32)
    feats = jnp.cos(pre + fb_ref[...]).astype(w2_ref.dtype)
    o_ref[...] = jnp.dot(
        feats, w2_ref[...], preferred_element_type=jnp.float32).astype(o_ref.dtype)


def _rfgp_kernel_multi(x_ref, fw_ref, fb_ref, w2_ref, o_ref, acc_ref):
    """Multiple rank steps: VMEM f32 accumulator, init/finalize via pl.when.

    NOTE: correctness of this pattern requires the rank (reduction) axis to be
    the innermost grid dimension (it is — grid = (i, j, r)).
    """
    r = pl.program_id(2)

    @pl.when(r == 0)
    def _init():
        acc_ref[...] = jnp.zeros_like(acc_ref)

    pre = jnp.dot(x_ref[...], fw_ref[...], preferred_element_type=jnp.float32)
    feats = jnp.cos(pre + fb_ref[...]).astype(w2_ref.dtype)
    acc_ref[...] += jnp.dot(feats, w2_ref[...], preferred_element_type=jnp.float32)

    @pl.when(r == pl.num_programs(2) - 1)
    def _finalize():
        o_ref[...] = acc_ref[...].astype(o_ref.dtype)


# ---------------------------------------------------------------------------
# Wrapper
# ---------------------------------------------------------------------------
def rfgp_forward_pallas(h, fw_p, fb_p, w2_p, *, out_dtype=jnp.float32,
                        tm_cap=256, tn_cap=512,
                        vmem_budget=40 * 1024 * 1024):
    """h: (M, D) compute dtype (bf16); fw_p: (D, Rp) bf16 (scale folded);
    fb_p: (1, Rp) f32; w2_p: (Rp, Np) bf16 (scale folded).  Returns (M, Np) f32."""
    M, D = h.shape
    D2, Rp = fw_p.shape
    Rp2, Np = w2_p.shape
    assert D == D2 and Rp == Rp2 and fb_p.shape == (1, Rp)
    assert Rp % 128 == 0 and Np % 128 == 0

    # --- tile sizes (lane-dense outputs, 8/128-aligned blocks) ---------------
    tm = min(tm_cap, _round_up(M, 8))
    Mp = _round_up(M, tm)
    tn = _largest_dividing_tile(Np, tn_cap)

    # Largest rank tile that fits the VMEM budget (ideally tr == Rp so the
    # reduction collapses to one step and no accumulator is needed).
    tr = 128
    for cand in range(128, Rp + 1, 128):
        if Rp % cand == 0 and _vmem_bytes(tm, D, cand, tn, cand < Rp) <= vmem_budget:
            tr = cand
    r_steps = Rp // tr

    h_p = h if Mp == M else jnp.pad(h, ((0, Mp - M), (0, 0)))

    grid = (Mp // tm, Np // tn, r_steps)

    cost = pl.CostEstimate(
        flops=int(2 * Mp * D * Rp * (Np // tn) + 2 * Mp * Rp * Np),
        transcendentals=int(Mp * Rp * (Np // tn)),
        bytes_accessed=int(h_p.size * h_p.dtype.itemsize
                           + fw_p.size * fw_p.dtype.itemsize
                           + fb_p.size * fb_p.dtype.itemsize
                           + w2_p.size * w2_p.dtype.itemsize
                           + Mp * Np * 4),
    )

    in_specs = [
        pl.BlockSpec((tm, D), lambda i, j, r: (i, 0)),     # h (resident across j, r)
        pl.BlockSpec((D, tr), lambda i, j, r: (0, r)),     # feature weights
        pl.BlockSpec((1, tr), lambda i, j, r: (0, r)),     # feature bias
        pl.BlockSpec((tr, tn), lambda i, j, r: (r, j)),    # output projection weights
    ]
    out_specs = pl.BlockSpec((tm, tn), lambda i, j, r: (i, j))

    if r_steps == 1:
        kernel, scratch = _rfgp_kernel_single, []
    else:
        kernel, scratch = _rfgp_kernel_multi, [pltpu.VMEM((tm, tn), jnp.float32)]

    vmem_limit = int(min(max(2 * _vmem_bytes(tm, D, tr, tn, r_steps > 1),
                             32 * 1024 * 1024),
                         60 * 1024 * 1024))

    out = pl.pallas_call(
        kernel,
        out_shape=jax.ShapeDtypeStruct((Mp, Np), out_dtype),
        grid_spec=pltpu.PrefetchScalarGridSpec(
            num_scalar_prefetch=0,
            grid=grid,
            in_specs=in_specs,
            out_specs=out_specs,
            scratch_shapes=scratch,
        ),
        compiler_params=pltpu.CompilerParams(
            dimension_semantics=("parallel", "parallel", "arbitrary"),
            vmem_limit_bytes=vmem_limit),
        cost_estimate=cost,
    )(h_p, fw_p, fb_p, w2_p)

    return out[:M, :]


# ---------------------------------------------------------------------------
# Module
# ---------------------------------------------------------------------------
class RandomFeatureGaussianProcessPallas:
    """JAX/Pallas port of the PyTorch RandomFeatureGaussianProcess (forward only)."""

    def __init__(self, in_features, out_features, lengthscale=math.sqrt(20.0),
                 outputscale=1.0, rank=1024, key=None, compute_dtype=jnp.bfloat16):
        self.in_features = in_features
        self.out_features = out_features
        self.lengthscale = float(lengthscale)
        self.outputscale = float(outputscale)
        self.rank = rank
        self.compute_dtype = compute_dtype

        if key is None:
            key = jax.random.PRNGKey(0)
        k_fw, k_fb, k_w = jax.random.split(key, 3)

        # Buffers / params mirroring the PyTorch module (random init via jax.random).
        self.feature_weight = jax.random.normal(k_fw, (rank, in_features), jnp.float32)
        self.feature_bias = 2.0 * math.pi * jax.random.uniform(k_fb, (rank,), jnp.float32)
        bound = 1.0 / math.sqrt(rank)  # nn.Linear default init bound
        self.out_weight = jax.random.uniform(
            k_w, (out_features, rank), jnp.float32, -bound, bound)

        # ---- one-time layout plumbing (NOT repeated per forward call) -------
        Rp = _round_up(rank, 128)
        Np = _round_up(out_features, 128)
        feat_scale = self.outputscale * math.sqrt(2.0 / rank)

        # Feature weights: transpose to (D, R), fold -1/lengthscale in, pad rank,
        # cast to bf16.  Padded rank columns are zero (=> cos(0+0)=1 feature),
        # nulled by the zero-padded projection rows below.
        fw_t = (-(1.0 / self.lengthscale)) * self.feature_weight.T          # (D, R)
        fw_t = jnp.pad(fw_t, ((0, 0), (0, Rp - rank)))
        self._fw_p = fw_t.astype(compute_dtype)                             # (D, Rp)

        # Feature bias: (1, Rp) f32 (bias add + cos stay in f32 — v5e-friendly).
        fb = self.feature_bias.reshape(1, rank)
        self._fb_p = jnp.pad(fb, ((0, 0), (0, Rp - rank)))                  # (1, Rp)

        # Output projection: transpose to (R, N), fold outputscale*sqrt(2/rank)
        # in, zero-pad rank rows (nulls padded features) and N columns, bf16.
        w2_t = feat_scale * self.out_weight.T                               # (R, N)
        w2_t = jnp.pad(w2_t, ((0, Rp - rank), (0, Np - out_features)))
        self._w2_p = w2_t.astype(compute_dtype)                             # (Rp, Np)

    def __call__(self, h):
        # forward expects 2-D (batch_size, hidden_dim), like the PyTorch module.
        M, D = h.shape
        assert D == self.in_features
        out = rfgp_forward_pallas(
            h.astype(self.compute_dtype),        # bf16 input: half the h DMA
            self._fw_p, self._fb_p, self._w2_p)
        return out[:, :self.out_features]


if __name__ == "__main__":
    batch, in_features, out_features, rank = 8, 32, 16, 1024

    root = jax.random.PRNGKey(0)
    k_init, k_x = jax.random.split(root)

    module = RandomFeatureGaussianProcessPallas(
        in_features=in_features, out_features=out_features,
        lengthscale=math.sqrt(20.0), outputscale=1.0, rank=rank, key=k_init)

    h = jax.random.normal(k_x, (batch, in_features), jnp.float32)

    logits = jax.block_until_ready(module(h))
    assert logits.shape == (batch, out_features)

    # Pure-JAX reference with matching numerics (scales folded into the bf16
    # weight copies exactly as the kernel sees them, f32 accumulation).
    cd = module.compute_dtype
    h_q = h.astype(cd).astype(jnp.float32)
    fw_f32 = module._fw_p.astype(jnp.float32)[:, :rank]                  # (D, R)
    fb = module._fb_p[0, :rank]
    w2_f32 = module._w2_p.astype(jnp.float32)[:rank, :out_features]     # (R, N)

    pre = h_q @ fw_f32 + fb
    feats = jnp.cos(pre).astype(cd).astype(jnp.float32)
    logits_ref = feats @ w2_f32

    np.testing.assert_allclose(
        np.asarray(logits), np.asarray(logits_ref), rtol=1e-2, atol=2e-3)

    print("KERNEL_OK")
</pallas_src>

<mosaic_0001>
module attributes {stable_mosaic.version = 11 : i64} {
  func.func @_rfgp_kernel_single(%arg0: i32, %arg1: i32, %arg2: i32, %arg3: memref<8x32xbf16, #tpu.memory_space<vmem>>, %arg4: memref<32x1024xbf16, #tpu.memory_space<vmem>>, %arg5: memref<1x1024xf32, #tpu.memory_space<vmem>>, %arg6: memref<1024x128xbf16, #tpu.memory_space<vmem>>, %arg7: memref<8x128xf32, #tpu.memory_space<vmem>>) attributes {dimension_semantics = [#tpu.dimension_semantics<parallel>, #tpu.dimension_semantics<parallel>, #tpu.dimension_semantics<arbitrary>], iteration_bounds = array<i64: 1, 1, 1>, scalar_prefetch = 0 : i64, scratch_operands = 0 : i64, tpu.core_type = #tpu.core_type<tc>, window_params = [{transform_indices = @transform_0, window_bounds = array<i64: 8, 32>}, {transform_indices = @transform_1, window_bounds = array<i64: 32, 1024>}, {transform_indices = @transform_2, window_bounds = array<i64: 1, 1024>}, {transform_indices = @transform_3, window_bounds = array<i64: 1024, 128>}, {transform_indices = @transform_4, window_bounds = array<i64: 8, 128>}]} {
    %c0 = arith.constant 0 : index
    %c0_0 = arith.constant 0 : index
    %0 = vector.load %arg3[%c0, %c0_0] : memref<8x32xbf16, #tpu.memory_space<vmem>>, vector<8x32xbf16>
    %c0_1 = arith.constant 0 : index
    %c0_2 = arith.constant 0 : index
    %1 = vector.load %arg4[%c0_1, %c0_2] : memref<32x1024xbf16, #tpu.memory_space<vmem>>, vector<32x1024xbf16>
    %cst = arith.constant dense<0.000000e+00> : vector<8x1024xf32>
    %2 = tpu.matmul %0, %1, %cst {dimension_numbers = #tpu.dot_dimension_numbers<[1], [0], [0], [1], [0, 0, 1, 1], [], []>} : vector<8x32xbf16>, vector<32x1024xbf16>, vector<8x1024xf32> -> vector<8x1024xf32>
    %c0_3 = arith.constant 0 : index
    %c0_4 = arith.constant 0 : index
    %3 = vector.load %arg5[%c0_3, %c0_4] : memref<1x1024xf32, #tpu.memory_space<vmem>>, vector<1x1024xf32>
    %4 = vector.broadcast %3 : vector<1x1024xf32> to vector<8x1024xf32>
    %5 = arith.addf %2, %4 : vector<8x1024xf32>
    %6 = math.cos %5 : vector<8x1024xf32>
    %7 = arith.truncf %6 : vector<8x1024xf32> to vector<8x1024xbf16>
    %c0_5 = arith.constant 0 : index
    %c0_6 = arith.constant 0 : index
    %8 = vector.load %arg6[%c0_5, %c0_6] : memref<1024x128xbf16, #tpu.memory_space<vmem>>, vector<1024x128xbf16>
    %cst_7 = arith.constant dense<0.000000e+00> : vector<8x128xf32>
    %9 = tpu.matmul %7, %8, %cst_7 {dimension_numbers = #tpu.dot_dimension_numbers<[1], [0], [0], [1], [0, 0, 1, 1], [], []>} : vector<8x1024xbf16>, vector<1024x128xbf16>, vector<8x128xf32> -> vector<8x128xf32>
    %c0_8 = arith.constant 0 : index
    %c0_9 = arith.constant 0 : index
    %10 = vector.load %arg7[%c0_8, %c0_9] : memref<8x128xf32, #tpu.memory_space<vmem>>, vector<8x128xf32>
    tpu.vector_store %arg7[%c0_8, %c0_9], %9 {strides = array<i32>} : memref<8x128xf32, #tpu.memory_space<vmem>>, vector<8x128xf32>,
    return
  }
  func.func @transform_0(%arg0: i32, %arg1: i32, %arg2: i32) -> (i32, i32) {
    %c0_i32 = arith.constant 0 : i32
    %c0_i32_0 = arith.constant 0 : i32
    return %arg0, %c0_i32 : i32, i32
  }
  func.func @transform_1(%arg0: i32, %arg1: i32, %arg2: i32) -> (i32, i32) {
    %c0_i32 = arith.constant 0 : i32
    %c0_i32_0 = arith.constant 0 : i32
    return %c0_i32, %arg2 : i32, i32
  }
  func.func @transform_2(%arg0: i32, %arg1: i32, %arg2: i32) -> (i32, i32) {
    %c0_i32 = arith.constant 0 : i32
    %c0_i32_0 = arith.constant 0 : i32
    return %c0_i32, %arg2 : i32, i32
  }
  func.func @transform_3(%arg0: i32, %arg1: i32, %arg2: i32) -> (i32, i32) {
    %c0_i32 = arith.constant 0 : i32
    return %arg2, %arg1 : i32, i32
  }
  func.func @transform_4(%arg0: i32, %arg1: i32, %arg2: i32) -> (i32, i32) {
    %c0_i32 = arith.constant 0 : i32
    return %arg0, %arg1 : i32, i32
  }
}

</mosaic_0001>

<bundles_post_ra>
// kernel: tpu_custom_call.1
= control target key start
LH: loop header
LB: loop body
LE: loop exit
PB: predicated region body
PF: predicated region fallthrough
CT: control target
= control target key end

     0   :  { %9 = vsyncpa [#allocation3], 0  ;;  %s3229_s0 = inlined_call_operand.hbm [shape: bf16[8,32], index: 0, kind: input, shape index: {}]   ;;  %s3230_s1 = inlined_call_operand.hbm [shape: bf16[32,1024], index: 1, kind: input, shape index: {}]   ;;  %s3231_s2 = inlined_call_operand.hbm [shape: f32[1,1024], index: 2, kind: input, shape index: {}]   ;;  %s3232_s3 = inlined_call_operand.hbm [shape: bf16[1024,128], index: 3, kind: input, shape index: {}]   ;;  %s3233_s4 = inlined_call_operand.hbm [shape: f32[8,128], index: 4, kind: output, shape index: {}]  }
   0x1   :  { %10 = vsyncpa [#allocation6], 0 }
   0x2   :  { %11 = vsyncpa [#allocation9], 0 }
   0x3   :  { %12 = vsyncpa [#allocation4], 0  ;;  %s2365_s15 = smov [#allocation5]   ;;  %s2247_s19 = scalar_lea.hbm %s3230_s1, 2048 }
   0x4   :  { %s28_s16 = sshll.u32 %s2365_s15, 4  ;;  %p2248_p0 = scmp.ne.s32.totalorder %s3230_s1, %s2247_s19  ;;  %s29_s16 = int_to_ptr.vmem [resolvable:$true] %s28_s16 }
   0x5   :  { %p2251_p1 = scmp.lt.u32.totalorder %s2247_s19, %s3230_s1 }
   0x7   :  { %p2253_p2 = pnand %p2251_p1, %p2248_p0 }
   0x9   :  { %2256 = shalt.err (!%p2253_p2)
}
   0xa   :  { %s2257_s24 = scalar_lea.vmem %s29_s16, 2048  ;;  %p2262_p4 = scmp.lt.s32.totalorder %s29_s16, %s29_s16 }
   0xb   :  { %p2258_p3 = scmp.ne.s32.totalorder %s29_s16, %s2257_s24  ;;  %p2263_p5 = scmp.lt.s32.totalorder %s2257_s24, %s2257_s24 }
   0xd   :  { %p2264_p6 = por %p2263_p5, %p2262_p4 }
   0xf   :  { %p2265_p7 = pnand %p2264_p6, %p2258_p3 }
  0x11   :  { %2268 = shalt.err (!%p2265_p7)
}
  0x12   :  { %s2366_s25 = smov 512   ;;  %s2367_s26 = smov 32  }
  0x13   :  { %34 = dma.hbm_to_vmem [thread:$0]  %s3230_s1, 2048, %s29_s16, [#allocation6], %s2366_s25, %s2366_s25, %s2367_s26  }
  0x14   :  { %s2368_s29 = smov [#allocation2]   ;;  %s2369_s5 = smov [#allocation7]  }
  0x15   :  { %s19_s30 = sshll.u32 %s2368_s29, 4  ;;  %s41_s6 = sshll.u32 %s2369_s5, 4  ;;  %s20_s30 = int_to_ptr.vmem [resolvable:$true] %s19_s30  ;;  %s42_s6 = int_to_ptr.vmem [resolvable:$true] %s41_s6 }
  0x16   :  { %s2269_s9 = scalar_lea.hbm %s3229_s0, 64 }
  0x17   :  { %p2270_p8 = scmp.ne.s32.totalorder %s3229_s0, %s2269_s9  ;;  %p2273_p9 = scmp.lt.u32.totalorder %s2269_s9, %s3229_s0 }
  0x19   :  { %p2275_p10 = pnand %p2273_p9, %p2270_p8 }
  0x1b   :  { %2278 = shalt.err (!%p2275_p10)
}
  0x1c   :  { %s2279_s1 = scalar_lea.vmem %s20_s30, 64  ;;  %p2284_p12 = scmp.lt.s32.totalorder %s20_s30, %s20_s30 }
  0x1d   :  { %p2280_p11 = scmp.ne.s32.totalorder %s20_s30, %s2279_s1  ;;  %p2285_p13 = scmp.lt.s32.totalorder %s2279_s1, %s2279_s1 }
  0x1f   :  { %p2286_p0 = por %p2285_p13, %p2284_p12 }
  0x21   :  { %p2287_p1 = pnand %p2286_p0, %p2280_p11 }
  0x23   :  { %2290 = shalt.err (!%p2287_p1)
}
  0x24   :  { %22 = dma.hbm_to_vmem [thread:$0]  %s3229_s0, 64, %s20_s30, [#allocation3]  }
  0x25   :  { %s2291_s18 = scalar_lea.hbm %s3231_s2, 128 }
  0x26   :  { %p2292_p2 = scmp.ne.s32.totalorder %s3231_s2, %s2291_s18  ;;  %p2295_p3 = scmp.lt.u32.totalorder %s2291_s18, %s3231_s2 }
  0x28   :  { %p2297_p4 = pnand %p2295_p3, %p2292_p2 }
  0x2a   :  { %2300 = shalt.err (!%p2297_p4)
}
  0x2b   :  { %s2301_s23 = scalar_lea.vmem %s42_s6, 128  ;;  %p2306_p6 = scmp.lt.s32.totalorder %s42_s6, %s42_s6 }
  0x2c   :  { %p2302_p5 = scmp.ne.s32.totalorder %s42_s6, %s2301_s23  ;;  %p2307_p7 = scmp.lt.s32.totalorder %s2301_s23, %s2301_s23 }
  0x2e   :  { %p2308_p8 = por %p2307_p7, %p2306_p6 }
  0x30   :  { %p2309_p9 = pnand %p2308_p8, %p2302_p5 }
  0x32   :  { %2312 = shalt.err (!%p2309_p9)
}
  0x33   :  { %44 = dma.hbm_to_vmem [thread:$0]  %s3231_s2, 128, %s42_s6, [#allocation6]  }
  0x34   :  { %s2370_s25 = smov [#allocation8]   ;;  %s2313_s29 = scalar_lea.hbm %s3232_s3, 8192 }
  0x35   :  { %s50_s26 = sshll.u32 %s2370_s25, 4  ;;  %p2314_p10 = scmp.ne.s32.totalorder %s3232_s3, %s2313_s29  ;;  %s51_s26 = int_to_ptr.vmem [resolvable:$true] %s50_s26 }
  0x36   :  { %p2317_p11 = scmp.lt.u32.totalorder %s2313_s29, %s3232_s3 }
  0x38   :  { %p2319_p12 = pnand %p2317_p11, %p2314_p10 }
  0x3a   :  { %2322 = shalt.err (!%p2319_p12)
}
  0x3b   :  { %s2323_s9 = scalar_lea.vmem %s51_s26, 8192  ;;  %p2328_p0 = scmp.lt.s32.totalorder %s51_s26, %s51_s26 }
  0x3c   :  { %p2324_p13 = scmp.ne.s32.totalorder %s51_s26, %s2323_s9  ;;  %p2329_p1 = scmp.lt.s32.totalorder %s2323_s9, %s2323_s9 }
  0x3e   :  { %p2330_p2 = por %p2329_p1, %p2328_p0 }
  0x40   :  { %p2331_p3 = pnand %p2330_p2, %p2324_p13 }
  0x42   :  { %2334 = shalt.err (!%p2331_p3)
}
  0x43   :  { %s2371_s2 = smov 64   ;;  %s2372_s6 = smov 4  }
  0x44   :  { %56 = dma.hbm_to_vmem [thread:$0]  %s3232_s3, 8192, %s51_s26, [#allocation9], %s2371_s2, %s2371_s2, %s2372_s6  }
  0x45   :  { %2357 = dma.done.wait [#allocation3], 64  }
  0x46   :  { %2358 = vsyncadd [#allocation3], 4294967232 }
  0x47   :  { %2359 = dma.done.wait [#allocation6], 2176  }
  0x48   :  { %2360 = vsyncadd [#allocation6], 4294965120 }
  0x49   :  { %2361 = dma.done.wait [#allocation9], 8192  }
  0x4a   :  { %2362 = vsyncadd [#allocation9], 4294959104  ;;  %v2373_v0 = vmov 0   ;;  %v71_v1 = vld [vmem:[#allocation5] sm:$0xff]  ;;  %v72_v3 = vld [vmem:[#allocation5 + $0x8] sm:$0xff]  ;;  %vm209_vm0 = vcmask 261120   ;;  %v89_v34 = vlaneseq }
  0x4b   :  { %245 = vmatprep.mubr.bf16.mxu0 %v2373_v0  ;;  %286 = vmatprep.mubr.bf16.mxu1 %v2373_v0  ;;  %v75_v2 = vld [vmem:[#allocation5 + $0x20] sm:$0xff]  ;;  %v76_v5 = vld [vmem:[#allocation5 + $0x28] sm:$0xff]  ;;  %v73_v15 = vld [vmem:[#allocation5 + $0x10] sm:$0xff]  ;;  %s2380_s3 = smov [#allocation10]  }
  0x4c   :  { %v1900_v4 = vcombine.high %v71_v1, %v75_v2  ;;  %v1899_v6 = vcombine.low %v71_v1, %v75_v2  ;;  %v79_v7 = vld [vmem:[#allocation5 + $0x40] sm:$0xff]  ;;  %v1902_v9 = vcombine.high %v72_v3, %v76_v5  ;;  %v1901_v10 = vcombine.low %v72_v3, %v76_v5  ;;  %v80_v12 = vld [vmem:[#allocation5 + $0x48] sm:$0xff]  ;;  %v77_v16 = vld [vmem:[#allocation5 + $0x30] sm:$0xff]  ;;  %s1888_s12 = sshll.u32 %s2380_s3, 4  ;;  %s1889_s12 = int_to_ptr.vmem [resolvable:$true] %s1888_s12 }
  0x4d   :  { %v83_v8 = vld [vmem:[#allocation5 + $0x60] sm:$0xff]  ;;  %v84_v13 = vld [vmem:[#allocation5 + $0x68] sm:$0xff]  ;;  %v74_v17 = vld [vmem:[#allocation5 + $0x18] sm:$0xff]  ;;  %v1904_v22 = vcombine.high %v73_v15, %v77_v16  ;;  %v1903_v28 = vcombine.low %v73_v15, %v77_v16  ;;  %v2458_v35 = vshrl.u32 %v89_v34, 7  ;;  %v2375_v34 = vmov 2475754826   ;;  %p2340_p5 = scmp.lt.s32.totalorder %s1889_s12, %s1889_s12 }
  0x4e   :  { %v1908_v11 = vcombine.high %v79_v7, %v83_v8  ;;  %213 = vmatprep.subr.bf16.mxu0 %v1900_v4  ;;  %v1910_v14 = vcombine.high %v80_v12, %v84_v13  ;;  %254 = vmatprep.subr.bf16.mxu1 %v1902_v9  ;;  %v1907_v18 = vcombine.low %v79_v7, %v83_v8  ;;  %v78_v19 = vld [vmem:[#allocation5 + $0x38] sm:$0xff]  ;;  %v81_v20 = vld [vmem:[#allocation5 + $0x50] sm:$0xff]  ;;  %v2461_v37 = vld [vmem:[#allocation7] sm:$0xff]  ;;  %s2335_s13 = scalar_lea.vmem %s1889_s12, 128 }
  0x4f   :  { %214 = vmatpush1.bf16.msra.mxu0 %v1899_v6  ;;  %255 = vmatpush1.bf16.msra.mxu1 %v1901_v10  ;;  %v1909_v21 = vcombine.low %v80_v12, %v84_v13  ;;  %v85_v23 = vld [vmem:[#allocation5 + $0x70] sm:$0xff]  ;;  %v82_v24 = vld [vmem:[#allocation5 + $0x58] sm:$0xff]  ;;  %v1906_v27 = vcombine.high %v74_v17, %v78_v19  ;;  %v1905_v29 = vcombine.low %v74_v17, %v78_v19  ;;  %v91_v36 = vsub.s32 0, %v2458_v35  ;;  %p2336_p4 = scmp.ne.s32.totalorder %s1889_s12, %s2335_s13  ;;  %p2341_p6 = scmp.lt.s32.totalorder %s2335_s13, %s2335_s13 }
  0x50   :  { %215 = vmatprep.subr.bf16.mxu0 %v1908_v11  ;;  %v86_v25 = vld [vmem:[#allocation5 + $0x78] sm:$0xff]  ;;  %256 = vmatprep.subr.bf16.mxu1 %v1910_v14  ;;  %v1912_v30 = vcombine.high %v81_v20, %v85_v23  ;;  %v1911_v32 = vcombine.low %v81_v20, %v85_v23  ;;  %v99_v38 = vsub.s32 2, %v2458_v35  ;;  %v95_v39 = vsub.s32 1, %v2458_v35 }
  0x51   :  { %v70_v26 = vld [vmem:[#allocation2] sm:$0xf]  ;;  %v1914_v31 = vcombine.high %v82_v24, %v86_v25  ;;  %v1913_v33 = vcombine.low %v82_v24, %v86_v25  ;;  %v92_v40 = vrot.slane %v2461_v37, %v91_v36  ;;  %v103_v43 = vsub.s32 3, %v2458_v35  ;;  %p2342_p7 = por %p2341_p6, %p2340_p5 }
  0x52   :  { %v100_v41 = vrot.slane %v2461_v37, %v99_v38  ;;  %v96_v42 = vrot.slane %v2461_v37, %v95_v39  ;;  %v2376_v39 = vmov 2131351028  }
  0x53   :  { %216 = vmatpush1.bf16.msra.mxu0 %v1907_v18  ;;  %257 = vmatpush1.bf16.msra.mxu1 %v1909_v21  ;;  %v104_v54 = vrot.slane %v2461_v37, %v103_v43  ;;  %v2378_v43 = vmov 920167782   ;;  %p2343_p8 = pnand %p2342_p7, %p2336_p4 }
  0x54   :  { %295 = vmatprep.subr.bf16.mxu0 %v1904_v22  ;;  %336 = vmatprep.subr.bf16.mxu1 %v1906_v27 }
  0x56   :  { %1915 = vmatmul.mubr.msk.bf16.vlgmr.msra.gmra.mrb[0].mxu0 %vm209_vm0, %v70_v26  ;;  %1916 = vmatmul.mubr.msk.bf16.vlgmr.msra.gmra.mrb[0].mxu1 %vm209_vm0, %v70_v26 }
  0x57   :  { %296 = vmatpush1.bf16.msra.mxu0 %v1903_v28  ;;  %337 = vmatpush1.bf16.msra.mxu1 %v1905_v29 }
  0x58   :  { %297 = vmatprep.subr.bf16.mxu0 %v1912_v30  ;;  %338 = vmatprep.subr.bf16.mxu1 %v1914_v31 }
  0x59   :  { %327 = vmatprep.mubr.bf16.mxu0 %v2373_v0  ;;  %368 = vmatprep.mubr.bf16.mxu1 %v2373_v0 }
  0x5b   :  { %298 = vmatpush1.bf16.msra.mxu0 %v1911_v32  ;;  %339 = vmatpush1.bf16.msra.mxu1 %v1913_v33  ;;  %v2374_v32 = vmov 683565275  }
  0x5e   :  { %1917 = vmatmul.mubr.msk.bf16.vlgmr.msra.gmra.mrb[4].mxu0 %vm209_vm0, %v70_v26  ;;  %1918 = vmatmul.mubr.msk.bf16.vlgmr.msra.gmra.mrb[4].mxu1 %vm209_vm0, %v70_v26 }
 0x129   :  { %v247_v44 = vpop.f32.mrb[0].mxu0  ;;  %v288_v46 = vpop.f32.mrb[0].mxu1 }
 0x12a   :  { %v2469_v45 = vadd.f32 %v247_v44, %v92_v40  ;;  %v249_v47 = vpop.f32.mrb[1].mxu0  ;;  %v2471_v48 = vadd.f32 %v288_v46, %v100_v41  ;;  %v290_v50 = vpop.f32.mrb[1].mxu1  ;;  %v3236_v41 = vmov 2102212464  }
 0x12b   :  { %v2473_v49 = vadd.f32 %v249_v47, %v96_v42  ;;  %v251_v51 = vpop.f32.mrb[2].mxu0  ;;  %v292_v55 = vpop.f32.mrb[2].mxu1  ;;  %v2486_v2 = vadd.f32 %v290_v50, %v104_v54  ;;  %v2379_v54 = vmov 1326507024  }
 0x12c   :  { %v377_v52 = vand.u32 2147483647, %v2469_v45  ;;  %v380_v53 = vand.u32 2139095040, %v2469_v45  ;;  %v252_v56 = vpop.f32.mrb[3].mxu0  ;;  %v583_v57 = vand.u32 2147483647, %v2471_v48 }
 0x12d   :  { %v586_v58 = vand.u32 2139095040, %v2471_v48  ;;  %v480_v61 = vand.u32 2147483647, %v2473_v49  ;;  %v483_v0 = vand.u32 2139095040, %v2473_v49  ;;  %v293_v6 = vpop.f32.mrb[3].mxu1  ;;  %v689_v30 = vand.u32 2139095040, %v2486_v2 }
 0x12e   :  { %v381_v59 = vshrl.u32 %v380_v53, 23  ;;  %v384_v60 = vand.u32 8388607, %v377_v52  ;;  %v590_v63 = vand.u32 8388607, %v583_v57 }
 0x12f   :  { %v587_v62 = vshrl.u32 %v586_v58, 23  ;;  %v484_v5 = vshrl.u32 %v483_v0, 23  ;;  %v2490_v8 = vand.u32 8388607, %v480_v61  ;;  %v686_v15 = vand.u32 2147483647, %v2486_v2 }
 0x130   :  { %v1919_v1 = vadd.s32 4294967169, %v381_v59  ;;  %v385_v3 = vor.u32 8388608, %v384_v60  ;;  %v591_v11 = vor.u32 8388608, %v590_v63 }
 0x131   :  { %v1927_v4 = vadd.s32 4294967169, %v587_v62  ;;  %v2492_v9 = vpop.f32.mrb[4].mxu0  ;;  %v2494_v10 = vpop.f32.mrb[4].mxu1  ;;  %v1923_v13 = vadd.s32 4294967169, %v484_v5  ;;  %v488_v24 = vor.u32 8388608, %v2490_v8 }
 0x132   :  { %v387_v7 = vadd.s32 1, %v1919_v1  ;;  %v2496_v14 = vpop.f32.mrb[5].mxu0  ;;  %v2499_v16 = vpop.f32.mrb[5].mxu1  ;;  %v2501_v18 = vshll.u32 %v385_v3, 8  ;;  %v2506_v28 = vshll.u32 %v591_v11, 8 }
 0x133   :  { %v593_v12 = vadd.s32 1, %v1927_v4  ;;  %v333_v19 = vpop.f32.mrb[6].mxu0  ;;  %v374_v20 = vpop.f32.mrb[6].mxu1  ;;  %v2508_v29 = vadd.s32 1, %v1923_v13 }
 0x134   :  { %vm388_vm1 = vcmp.gt.s32.totalorder %v387_v7, 0  ;;  %v334_v25 = vpop.f32.mrb[7].mxu0  ;;  %v375_v26 = vpop.f32.mrb[7].mxu1 }
 0x135   :  { %v389_v17 = vsel %vm388_vm1, %v387_v7, 0  ;;  %vm594_vm2 = vcmp.gt.s32.totalorder %v593_v12, 0  ;;  %vm491_vm7 = vcmp.gt.s32.totalorder %v2508_v29, 0 }
 0x136   :  { %v390_v21 = vshrl.u32 %v389_v17, 5  ;;  %v391_v22 = vand.u32 31, %v389_v17  ;;  %v595_v23 = vsel %vm594_vm2, %v593_v12, 0 }
 0x137   :  { %v2504_v27 = vshrl.u32 %v595_v23, 5  ;;  %v597_v38 = vand.u32 31, %v595_v23 }
 0x138   :  { %v392_v31 = vsub.s32 32, %v391_v22  ;;  %v394_v33 = vshll.u32 %v2374_v32, %v391_v22  ;;  %v397_v36 = vshll.u32 %v2375_v34, %v391_v22  ;;  %v400_v40 = vshll.u32 %v2376_v39, %v391_v22 }
 0x139   :  { %v403_v42 = vshll.u32 %v3236_v41, %v391_v22  ;;  %v406_v44 = vshll.u32 %v2378_v43, %v391_v22  ;;  %vm409_vm3 = vcmp.lt.s32.totalorder %v390_v21, 1  ;;  %vm410_vm4 = vcmp.lt.s32.totalorder %v390_v21, 2 }
 0x13a   :  { %v395_v46 = vshrl.u32 %v2375_v34, %v392_v31  ;;  %v398_v47 = vshrl.u32 %v2376_v39, %v392_v31  ;;  %v401_v50 = vshrl.u32 %v3236_v41, %v392_v31  ;;  %v393_v51 = vshrl.u32 %v2374_v32, %v392_v31 }
 0x13b   :  { %v404_v53 = vshrl.u32 %v2378_v43, %v392_v31  ;;  %v407_v55 = vshrl.u32 %v2379_v54, %v392_v31  ;;  %vm411_vm5 = vcmp.lt.s32.totalorder %v390_v21, 3  ;;  %v598_v60 = vsub.s32 32, %v597_v38 }
 0x13c   :  { %v396_v56 = vor.u32 %v395_v46, %v394_v33  ;;  %v399_v58 = vor.u32 %v398_v47, %v397_v36  ;;  %v402_v59 = vor.u32 %v401_v50, %v400_v40  ;;  %vm412_vm6 = vcmp.lt.s32.totalorder %v390_v21, 4 }
 0x13d   :  { %v405_v62 = vor.u32 %v404_v53, %v403_v42  ;;  %v408_v63 = vor.u32 %v407_v55, %v406_v44  ;;  %v600_v0 = vshll.u32 %v2374_v32, %v597_v38  ;;  %v603_v12 = vshll.u32 %v2375_v34, %v597_v38 }
 0x13e   :  { %v413_v1 = vsel %vm409_vm3, %v393_v51, %v396_v56  ;;  %v414_v3 = vsel %vm412_vm6, %v402_v59, 2102212464  ;;  %v417_v4 = vsel %vm409_vm3, %v396_v56, %v399_v58  ;;  %v421_v5 = vsel %vm409_vm3, %v399_v58, %v402_v59 }
 0x13f   :  { %v415_v6 = vsel %vm411_vm5, %v399_v58, %v414_v3  ;;  %v418_v7 = vsel %vm412_vm6, %v405_v62, 920167782  ;;  %v422_v11 = vsel %vm412_vm6, %v408_v63, 1326507024  ;;  %v599_v19 = vshrl.u32 %v2374_v32, %v598_v60 }
 0x140   :  { %v419_v13 = vsel %vm411_vm5, %v402_v59, %v418_v7  ;;  %v423_v17 = vsel %vm411_vm5, %v405_v62, %v422_v11  ;;  %v601_v20 = vshrl.u32 %v2375_v34, %v598_v60  ;;  %v416_v22 = vsel %vm410_vm4, %v413_v1, %v415_v6 }
 0x141   :  { %v420_v23 = vsel %vm410_vm4, %v417_v4, %v419_v13  ;;  %v424_v25 = vsel %vm410_vm4, %v421_v5, %v423_v17  ;;  %v604_v26 = vshrl.u32 %v2376_v39, %v598_v60  ;;  %v606_v46 = vshll.u32 %v2376_v39, %v597_v38 }
 0x142   :  { %v2538_v31 = vmul.u32.u64.low %v2501_v18, %v424_v25  ;;  %v2539_v33 = vmul.u32.u64.high %v2501_v18, %v424_v25, %v2538_v31  ;;  %v2542_v36 = vmul.u32.u64.low %v2501_v18, %v420_v23  ;;  %v2543_v40 = vmul.u32.u64.high %v2501_v18, %v420_v23, %v2542_v36 }
 0x143   :  { %v602_v42 = vor.u32 %v601_v20, %v600_v0  ;;  %v605_v44 = vor.u32 %v604_v26, %v603_v12  ;;  %v607_v47 = vshrl.u32 %v3236_v41, %v598_v60  ;;  %v609_v21 = vshll.u32 %v3236_v41, %v597_v38 }
 0x144   :  { %v610_v50 = vshrl.u32 %v2378_v43, %v598_v60  ;;  %v612_v51 = vshll.u32 %v2378_v43, %v597_v38  ;;  %v613_v53 = vshrl.u32 %v2379_v54, %v598_v60  ;;  %v432_v55 = vmul.u32 %v2501_v18, %v416_v22 }
 0x145   :  { %v608_v56 = vor.u32 %v607_v47, %v606_v46  ;;  %vm615_vm8 = vcmp.lt.s32.totalorder %v2504_v27, 1  ;;  %vm616_vm9 = vcmp.lt.s32.totalorder %v2504_v27, 2  ;;  %vm434_vm10 = vc.u32 %v2539_v33, %v2542_v36 }
 0x146   :  { %v435_v58 = vadd.s32 1, %v2543_v40  ;;  %v611_v59 = vor.u32 %v610_v50, %v609_v21  ;;  %vm617_vm11 = vcmp.lt.s32.totalorder %v2504_v27, 3  ;;  %v614_v62 = vor.u32 %v613_v53, %v612_v51 }
 0x147   :  { %vm618_vm12 = vcmp.lt.s32.totalorder %v2504_v27, 4  ;;  %v619_v38 = vsel %vm615_vm8, %v599_v19, %v602_v42  ;;  %v623_v60 = vsel %vm615_vm8, %v602_v42, %v605_v44  ;;  %v627_v1 = vsel %vm615_vm8, %v605_v44, %v608_v56 }
 0x148   :  { %v436_v18 = vsel %vm434_vm10, %v435_v58, %v2543_v40  ;;  %v620_v63 = vsel %vm618_vm12, %v608_v56, 2102212464  ;;  %v624_v0 = vsel %vm618_vm12, %v611_v59, 920167782  ;;  %v628_v6 = vsel %vm618_vm12, %v614_v62, 1326507024 }
 0x149   :  { %v437_v3 = vadd.s32 %v436_v18, %v432_v55  ;;  %v621_v4 = vsel %vm617_vm11, %v605_v44, %v620_v63  ;;  %v625_v5 = vsel %vm617_vm11, %v608_v56, %v624_v0  ;;  %v629_v11 = vsel %vm617_vm11, %v611_v59, %v628_v6 }
 0x14a   :  { %v626_v7 = vsel %vm616_vm9, %v623_v60, %v625_v5  ;;  %v492_v12 = vsel %vm491_vm7, %v2508_v29, 0  ;;  %v690_v13 = vshrl.u32 %v689_v30, 23  ;;  %v630_v19 = vsel %vm616_vm9, %v627_v1, %v629_v11 }
 0x14b   :  { %v438_v17 = vadd.s32 536870912, %v437_v3  ;;  %v2571_v20 = vmul.u32.u64.low %v2506_v28, %v626_v7  ;;  %v2572_v22 = vmul.u32.u64.high %v2506_v28, %v626_v7, %v2571_v20  ;;  %v622_v23 = vsel %vm616_vm9, %v619_v38, %v621_v4 }
 0x14c   :  { %v2578_v25 = vmul.u32.u64.low %v2506_v28, %v630_v19  ;;  %v2579_v26 = vmul.u32.u64.high %v2506_v28, %v630_v19, %v2578_v25  ;;  %v2581_v29 = vshrl.u32 %v492_v12, 5  ;;  %v494_v30 = vand.u32 31, %v492_v12 }
 0x14d   :  { %v2583_v31 = vshrl.u32 %v438_v17, 30  ;;  %v2587_v40 = vshll.u32 %v488_v24, 8  ;;  %v2591_v42 = vand.u32 8388607, %v686_v15  ;;  %v107_v27 = vsub.s32 4, %v2458_v35 }
 0x14e   :  { %v638_v46 = vmul.u32 %v2506_v28, %v622_v23  ;;  %v641_v47 = vadd.s32 1, %v2572_v22  ;;  %v495_v21 = vsub.s32 32, %v494_v30  ;;  %vm640_vm13 = vc.u32 %v2579_v26, %v2571_v20 }
 0x14f   :  { %v440_v44 = vshll.u32 %v2583_v31, 30  ;;  %vm512_vm14 = vcmp.lt.s32.totalorder %v2581_v29, 1  ;;  %vm513_vm15 = vcmp.lt.s32.totalorder %v2581_v29, 2  ;;  %v1931_v8 = vadd.s32 4294967169, %v690_v13 }
 0x150   :  { %v642_v50 = vsel %vm640_vm13, %v641_v47, %v2572_v22  ;;  %v497_v51 = vshll.u32 %v2374_v32, %v494_v30  ;;  %v500_v53 = vshll.u32 %v2375_v34, %v494_v30  ;;  %v498_v55 = vshrl.u32 %v2375_v34, %v495_v21 }
 0x151   :  { %v2601_v24 = vsub.s32 %v437_v3, %v440_v44  ;;  %v643_v28 = vadd.s32 %v642_v50, %v638_v46  ;;  %v501_v56 = vshrl.u32 %v2376_v39, %v495_v21  ;;  %v503_v58 = vshll.u32 %v2376_v39, %v494_v30 }
 0x152   :  { %v504_v62 = vshrl.u32 %v3236_v41, %v495_v21  ;;  %v506_v38 = vshll.u32 %v3236_v41, %v494_v30  ;;  %v507_v60 = vshrl.u32 %v2378_v43, %v495_v21  ;;  %v499_v63 = vor.u32 %v498_v55, %v497_v51 }
 0x153   :  { %v443_v59 = vsub.s32 0, %v2601_v24  ;;  %v644_v18 = vadd.s32 536870912, %v643_v28  ;;  %v502_v0 = vor.u32 %v501_v56, %v500_v53  ;;  %v509_v1 = vshll.u32 %v2378_v43, %v494_v30 }
 0x154   :  { %v505_v4 = vor.u32 %v504_v62, %v503_v58  ;;  %v508_v5 = vor.u32 %v507_v60, %v506_v38  ;;  %v510_v6 = vshrl.u32 %v2379_v54, %v495_v21  ;;  %vm514_vm0 = vcmp.lt.s32.totalorder %v2581_v29, 3  ;;  %v2151_v62 = vld [vmem:[#allocation8 + $0x40] sm:$0xff]  }
 0x155   :  { %v1920_v3 = vmin.u32 %v443_v59, %v2601_v24  ;;  %v2616_v7 = vshrl.u32 %v644_v18, 30  ;;  %vm515_vm1 = vcmp.lt.s32.totalorder %v2581_v29, 4  ;;  %v520_v11 = vsel %vm512_vm14, %v499_v63, %v502_v0  ;;  %v2152_v38 = vld [vmem:[#allocation8 + $0xc0] sm:$0xff]   ;;  %2015 = vmatprep.subr.bf16.mxu0 %v2151_v62 }
 0x156   :  { %v511_v13 = vor.u32 %v510_v6, %v509_v1  ;;  %v517_v17 = vsel %vm515_vm1, %v505_v4, 2102212464  ;;  %v521_v19 = vsel %vm515_vm1, %v508_v5, 920167782  ;;  %v496_v23 = vshrl.u32 %v2374_v32, %v495_v21  ;;  %v2153_v1 = vld [vmem:[#allocation8] sm:$0xff]   ;;  %2037 = vmatprep.subr.bf16.mxu1 %v2152_v38  ;;  %v2160_v38 = vld [vmem:[#allocation8 + $0xd0] sm:$0xff]  }
 0x157   :  { %v445_v12 = vclz %v1920_v3  ;;  %v646_v22 = vshll.u32 %v2616_v7, 30  ;;  %v522_v25 = vsel %vm514_vm0, %v505_v4, %v521_v19  ;;  %v696_v30 = vadd.s32 1, %v1931_v8  ;;  %v2154_v3 = vld [vmem:[#allocation8 + $0x80] sm:$0xff]   ;;  %2016 = vmatpush3.bf16.msra.mxu0 %v2153_v1 }
 0x158   :  { %v523_v46 = vsel %vm513_vm15, %v520_v11, %v522_v25  ;;  %v524_v47 = vsel %vm512_vm14, %v502_v0, %v505_v4  ;;  %v694_v50 = vor.u32 8388608, %v2591_v42  ;;  %v516_v53 = vsel %vm512_vm14, %v496_v23, %v499_v63  ;;  %2038 = vmatpush3.bf16.msra.mxu1 %v2154_v3  ;;  %v2156_v23 = vld [vmem:[#allocation8 + $0xc8] sm:$0xff]  }
 0x159   :  { %v1921_v44 = vadd.s32 4294967294, %v445_v12  ;;  %v2635_v51 = vsub.s32 %v643_v28, %v646_v22  ;;  %v518_v21 = vsel %vm514_vm0, %v502_v0, %v517_v17  ;;  %v525_v8 = vsel %vm515_vm1, %v511_v13, 1326507024  ;;  %v2155_v22 = vld [vmem:[#allocation8 + $0x48] sm:$0xff]   ;;  %2039 = vmatprep.subr.bf16.mxu1 %v2156_v23 }
 0x15a   :  { %v526_v55 = vsel %vm514_vm0, %v508_v5, %v525_v8  ;;  %v2646_v56 = vmul.u32.u64.low %v2587_v40, %v523_v46  ;;  %v2647_v58 = vmul.u32.u64.high %v2587_v40, %v523_v46, %v2646_v56  ;;  %vm697_vm3 = vcmp.gt.s32.totalorder %v696_v30, 0  ;;  %2017 = vmatprep.subr.bf16.mxu0 %v2155_v22 }
 0x15b   :  { %vm1922_vm2 = vcmp.lt.s32.totalorder %v1921_v44, 0  ;;  %v649_v28 = vsub.s32 0, %v2635_v51  ;;  %v527_v59 = vsel %vm513_vm15, %v524_v47, %v526_v55  ;;  %v433_v60 = vadd.s32 %v2542_v36, %v2539_v33  ;;  %v2157_v47 = vld [vmem:[#allocation8 + $0x8] sm:$0xff]  }
 0x15c   :  { %v448_v42 = vsel %vm1922_vm2, 0, %v1921_v44  ;;  %v698_v0 = vsel %vm697_vm3, %v696_v30, 0  ;;  %v519_v5 = vsel %vm513_vm15, %v516_v53, %v518_v21  ;;  %v538_v33 = vadd.s32 1, %v2647_v58  ;;  %v2158_v53 = vld [vmem:[#allocation8 + $0x88] sm:$0xff]   ;;  %2018 = vmatpush3.bf16.msra.mxu0 %v2157_v47 }
 0x15d   :  { %v449_v18 = vsub.s32 32, %v448_v42  ;;  %v453_v63 = vsub.s32 4294967266, %v448_v42  ;;  %v1928_v4 = vmin.u32 %v649_v28, %v2635_v51  ;;  %v700_v36 = vand.u32 31, %v698_v0  ;;  %2040 = vmatpush3.bf16.msra.mxu1 %v2158_v53 }
 0x15e   :  { %v2659_v6 = vmul.u32.u64.low %v2587_v40, %v527_v59  ;;  %v2660_v11 = vmul.u32.u64.high %v2587_v40, %v527_v59, %v2659_v6  ;;  %v2663_v19 = vshrl.u32 %v698_v0, 5  ;;  %v2668_v29 = vrot.slane %v2461_v37, %v107_v27  ;;  %2041 = vmatprep.subr.bf16.mxu1 %v2160_v38 }
 0x15f   :  { %v451_v12 = vshrl.u32 %v433_v60, %v449_v18  ;;  %v454_v13 = vadd.s32 127, %v453_v63  ;;  %v651_v17 = vclz %v1928_v4  ;;  %v450_v25 = vshll.u32 %v2601_v24, %v448_v42 }
 0x160   :  { %v701_v44 = vsub.s32 32, %v700_v36  ;;  %v115_v46 = vsub.s32 6, %v2458_v35  ;;  %v535_v8 = vmul.u32 %v2587_v40, %v519_v5  ;;  %vm537_vm4 = vc.u32 %v2660_v11, %v2646_v56 }
 0x161   :  { %v455_v30 = vshll.u32 %v454_v13, 23  ;;  %v1929_v21 = vadd.s32 4294967294, %v651_v17  ;;  %v2675_v55 = vshll.u32 %v694_v50, 8  ;;  %v452_v27 = vor.u32 %v451_v12, %v450_v25  ;;  %v2159_v50 = vld [vmem:[#allocation8 + $0x50] sm:$0xff]   ;;  %v2163_v25 = vld [vmem:[#allocation8 + $0x58] sm:$0xff]  }
 0x162   :  { %v639_v24 = vadd.s32 %v2571_v20, %v2579_v26  ;;  %v539_v42 = vsel %vm537_vm4, %v538_v33, %v2647_v58  ;;  %v704_v40 = vshrl.u32 %v2375_v34, %v701_v44  ;;  %v707_v62 = vshrl.u32 %v2376_v39, %v701_v44  ;;  %v2161_v26 = vld [vmem:[#allocation8 + $0x10] sm:$0xff]   ;;  %2019 = vmatprep.subr.bf16.mxu0 %v2159_v50 }
 0x163   :  { %v456_v28 = vor.u32 4788187, %v455_v30  ;;  %vm1930_vm5 = vcmp.lt.s32.totalorder %v1929_v21, 0  ;;  %v540_v59 = vadd.s32 %v539_v42, %v535_v8  ;;  %vm718_vm6 = vcmp.lt.s32.totalorder %v2663_v19, 1  ;;  %v2162_v58 = vld [vmem:[#allocation8 + $0x90] sm:$0xff]   ;;  %2020 = vmatpush3.bf16.msra.mxu0 %v2161_v26  ;;  %v2164_v30 = vld [vmem:[#allocation8 + $0xd8] sm:$0xff]  }
 0x164   :  { %v654_v60 = vsel %vm1930_vm5, 0, %v1929_v21  ;;  %v703_v18 = vshll.u32 %v2374_v32, %v700_v36  ;;  %v706_v63 = vshll.u32 %v2375_v34, %v700_v36  ;;  %v710_v20 = vshrl.u32 %v3236_v41, %v701_v44  ;;  %2042 = vmatpush3.bf16.msra.mxu1 %v2162_v58  ;;  %2021 = vmatprep.subr.bf16.mxu0 %v2163_v25 }
 0x165   :  { %v655_v0 = vsub.s32 32, %v654_v60  ;;  %v659_v1 = vsub.s32 4294967266, %v654_v60  ;;  %v541_v3 = vadd.s32 536870912, %v540_v59  ;;  %v709_v4 = vshll.u32 %v2376_v39, %v700_v36  ;;  %2043 = vmatprep.subr.bf16.mxu1 %v2164_v30 }
 0x166   :  { %v457_v5 = vand.u32 2147483647, %v456_v28  ;;  %v459_v6 = vcvt.s32.f32 %v452_v27  ;;  %v705_v12 = vor.u32 %v704_v40, %v703_v18  ;;  %v708_v13 = vor.u32 %v707_v62, %v706_v63  ;;  %v2165_v27 = vld [vmem:[#allocation8 + $0x18] sm:$0xff]  }
 0x167   :  { %vm719_vm7 = vcmp.lt.s32.totalorder %v2663_v19, 2  ;;  %v657_v33 = vshrl.u32 %v639_v24, %v655_v0  ;;  %v660_v17 = vadd.s32 127, %v659_v1  ;;  %v2688_v22 = vshrl.u32 %v541_v3, 30  ;;  %v2166_v28 = vld [vmem:[#allocation8 + $0x98] sm:$0xff]   ;;  %2022 = vmatpush3.bf16.msra.mxu0 %v2165_v27  ;;  %v2170_v1 = vld [vmem:[#allocation8 + $0xa0] sm:$0xff]  }
 0x168   :  { %v711_v23 = vor.u32 %v710_v20, %v709_v4  ;;  %v712_v47 = vshll.u32 %v3236_v41, %v700_v36  ;;  %v713_v53 = vshrl.u32 %v2378_v43, %v701_v44  ;;  %v715_v21 = vshll.u32 %v2378_v43, %v700_v36  ;;  %2044 = vmatpush3.bf16.msra.mxu1 %v2166_v28  ;;  %v2173_v28 = vld [vmem:[#allocation8 + $0x28] sm:$0xff]  }
 0x169   :  { %v716_v8 = vshrl.u32 %v2379_v54, %v701_v44  ;;  %v656_v42 = vshll.u32 %v2635_v51, %v654_v60  ;;  %v661_v24 = vshll.u32 %v660_v17, 23  ;;  %v543_v40 = vshll.u32 %v2688_v22, 30  ;;  %v2167_v51 = vld [vmem:[#allocation8 + $0x60] sm:$0xff]  }
 0x16a   :  { %vm720_vm8 = vcmp.lt.s32.totalorder %v2663_v19, 3  ;;  %v460_v62 = vmul.f32 %v459_v6, %v457_v5  ;;  %v702_v50 = vshrl.u32 %v2374_v32, %v701_v44  ;;  %v714_v38 = vor.u32 %v713_v53, %v712_v47  ;;  %v2168_v60 = vld [vmem:[#allocation8 + $0xe0] sm:$0xff]   ;;  %2023 = vmatprep.subr.bf16.mxu0 %v2167_v51  ;;  %v2171_v53 = vld [vmem:[#allocation8 + $0x68] sm:$0xff]  }
 0x16b   :  { %v717_v18 = vor.u32 %v716_v8, %v715_v21  ;;  %v658_v36 = vor.u32 %v657_v33, %v656_v42  ;;  %v662_v63 = vor.u32 4788187, %v661_v24  ;;  %v2698_v20 = vsub.s32 %v540_v59, %v543_v40  ;;  %v2169_v59 = vld [vmem:[#allocation8 + $0x20] sm:$0xff]   ;;  %2045 = vmatprep.subr.bf16.mxu1 %v2168_v60  ;;  %v2172_v21 = vld [vmem:[#allocation8 + $0xe8] sm:$0xff]   ;;  %v2175_v60 = vld [vmem:[#allocation8 + $0x70] sm:$0xff]  }
 0x16c   :  { %vm721_vm9 = vcmp.lt.s32.totalorder %v2663_v19, 4  ;;  %v726_v58 = vsel %vm718_vm6, %v705_v12, %v708_v13  ;;  %v2709_v0 = vadd.f32 %v2492_v9, %v2668_v29  ;;  %v722_v5 = vsel %vm718_vm6, %v702_v50, %v705_v12  ;;  %2024 = vmatpush3.bf16.msra.mxu0 %v2169_v59  ;;  %2046 = vmatpush3.bf16.msra.mxu1 %v2170_v1  ;;  %v2174_v42 = vld [vmem:[#allocation8 + $0xa8] sm:$0xff]  }
 0x16d   :  { %v723_v26 = vsel %vm721_vm9, %v711_v23, 2102212464  ;;  %v727_v44 = vsel %vm721_vm9, %v714_v38, 920167782  ;;  %v663_v3 = vand.u32 2147483647, %v662_v63  ;;  %v730_v9 = vsel %vm718_vm6, %v708_v13, %v711_v23  ;;  %2025 = vmatprep.subr.bf16.mxu0 %v2171_v53  ;;  %2047 = vmatprep.subr.bf16.mxu1 %v2172_v21 }
 0x16e   :  { %v546_v4 = vsub.s32 0, %v2698_v20  ;;  %v724_v6 = vsel %vm720_vm8, %v708_v13, %v723_v26  ;;  %v461_v33 = vxor.u32 2147483648, %v460_v62  ;;  %v728_v17 = vsel %vm720_vm8, %v711_v23, %v727_v44  ;;  %v2176_v26 = vld [vmem:[#allocation8 + $0xf0] sm:$0xff]   ;;  %v2183_v53 = vld [vmem:[#allocation8 + $0x140] sm:$0xff]  }
 0x16f   :  { %v731_v29 = vsel %vm721_vm9, %v717_v18, 1326507024  ;;  %v665_v25 = vcvt.s32.f32 %v658_v36  ;;  %v729_v12 = vsel %vm719_vm7, %v726_v58, %v728_v17  ;;  %v725_v8 = vsel %vm719_vm7, %v722_v5, %v724_v6  ;;  %v2177_v58 = vld [vmem:[#allocation8 + $0x30] sm:$0xff]   ;;  %v2179_v5 = vld [vmem:[#allocation8 + $0x78] sm:$0xff]  }
 0x170   :  { %v1924_v30 = vmin.u32 %v546_v4, %v2698_v20  ;;  %v732_v47 = vsel %vm720_vm8, %v714_v38, %v731_v29  ;;  %v2732_v23 = vmul.u32.u64.low %v2675_v55, %v729_v12  ;;  %v2733_v27 = vmul.u32.u64.high %v2675_v55, %v729_v12, %v2732_v23  ;;  %2026 = vmatpush3.bf16.msra.mxu0 %v2173_v28  ;;  %2048 = vmatpush3.bf16.msra.mxu1 %v2174_v42  ;;  %v2178_v4 = vld [vmem:[#allocation8 + $0xb0] sm:$0xff]  }
 0x171   :  { %v733_v13 = vsel %vm719_vm7, %v730_v9, %v732_v47  ;;  %v666_v24 = vmul.f32 %v665_v25, %v663_v3  ;;  %v792_v18 = vand.u32 2139095040, %v2709_v0  ;;  %v111_v19 = vsub.s32 5, %v2458_v35  ;;  %2027 = vmatprep.subr.bf16.mxu0 %v2175_v60  ;;  %2049 = vmatprep.subr.bf16.mxu1 %v2176_v26  ;;  %v2181_v9 = vld [vmem:[#allocation8 + $0x38] sm:$0xff]  }
 0x172   :  { %v548_v40 = vclz %v1924_v30  ;;  %v2737_v50 = vmul.u32.u64.low %v2675_v55, %v733_v13  ;;  %v2738_v38 = vmul.u32.u64.high %v2675_v55, %v733_v13, %v2737_v50  ;;  %vm379_vm10 = vcmp.lt.s32.totalorder %v2469_v45, 0  ;;  %v2182_v47 = vld [vmem:[#allocation8 + $0xb8] sm:$0xff]   ;;  %v2184_v13 = vld [vmem:[#allocation8 + $0x1c0] sm:$0xff]  }
 0x173   :  { %v116_v63 = vrot.slane %v2461_v37, %v115_v46  ;;  %v119_v51 = vsub.s32 7, %v2458_v35  ;;  %v462_v44 = vsel %vm379_vm10, %v461_v33, %v460_v62  ;;  %v741_v59 = vmul.u32 %v2675_v55, %v725_v8  ;;  %v2180_v46 = vld [vmem:[#allocation8 + $0xf8] sm:$0xff]  }
 0x174   :  { %v1925_v36 = vadd.s32 4294967294, %v548_v40  ;;  %v744_v1 = vadd.s32 1, %v2733_v27  ;;  %v793_v3 = vshrl.u32 %v792_v18, 23  ;;  %v667_v6 = vxor.u32 2147483648, %v666_v24  ;;  %2028 = vmatpush3.bf16.msra.mxu0 %v2177_v58  ;;  %2050 = vmatpush3.bf16.msra.mxu1 %v2178_v4 }
 0x175   :  { %vm743_vm12 = vc.u32 %v2738_v38, %v2732_v23  ;;  %v789_v35 = vand.u32 2147483647, %v2709_v0  ;;  %v463_v17 = vsub.s32 4, %v2583_v31  ;;  %vm2760_vm13 = vcmp.le.f32.partialorder %v377_v52, 0.7853982  ;;  %2029 = vmatprep.subr.bf16.mxu0 %v2179_v5  ;;  %2051 = vmatprep.subr.bf16.mxu1 %v2180_v46 }
 0x176   :  { %vm1926_vm11 = vcmp.lt.s32.totalorder %v1925_v36, 0  ;;  %v745_v55 = vsel %vm743_vm12, %v744_v1, %v2733_v27  ;;  %v1935_v33 = vadd.s32 4294967169, %v793_v3  ;;  %v2766_v12 = vrot.slane %v2461_v37, %v111_v19 }
 0x177   :  { %v2755_v62 = vsel %vm1926_vm11, 0, %v1925_v36  ;;  %v746_v30 = vadd.s32 %v745_v55, %v741_v59  ;;  %v2771_v21 = vsel %vm2760_vm13, %v2469_v45, %v462_v44  ;;  %vm585_vm14 = vcmp.lt.s32.totalorder %v2471_v48, 0 }
 0x178   :  { %v556_v25 = vsub.s32 4294967266, %v2755_v62  ;;  %v799_v52 = vadd.s32 1, %v1935_v33  ;;  %v2775_v8 = vrot.slane %v2461_v37, %v119_v51  ;;  %v668_v27 = vsel %vm585_vm14, %v667_v6, %v666_v24  ;;  %2030 = vmatpush3.bf16.msra.mxu0 %v2181_v9  ;;  %2052 = vmatpush3.bf16.msra.mxu1 %v2182_v47 }
 0x179   :  { %v552_v28 = vsub.s32 32, %v2755_v62  ;;  %v747_v42 = vadd.s32 536870912, %v746_v30  ;;  %v796_v40 = vand.u32 8388607, %v789_v35  ;;  %v2785_v50 = vsel %vm379_vm10, %v463_v17, %v2583_v31  ;;  %2059 = vmatprep.subr.bf16.mxu0 %v2183_v53  ;;  %2081 = vmatprep.subr.bf16.mxu1 %v2184_v13 }
 0x17a   :  { %vm2789_vm15 = vcmp.le.f32.partialorder %v583_v57, 0.7853982  ;;  %v669_v18 = vsub.s32 4, %v2616_v7  ;;  %vm800_vm0 = vcmp.gt.s32.totalorder %v799_v52, 0  ;;  %v536_v24 = vadd.s32 %v2646_v56, %v2660_v11 }
 0x17b   :  { %v557_v19 = vadd.s32 127, %v556_v25  ;;  %v2796_v36 = vshrl.u32 %v747_v42, 30  ;;  %v801_v51 = vsel %vm800_vm0, %v799_v52, 0  ;;  %2215 = vcosq.f32 %v2771_v21 }
 0x17c   :  { %v2802_v57 = vsel %vm2789_vm15, %v2471_v48, %v668_v27  ;;  %v803_v31 = vand.u32 31, %v801_v51  ;;  %v2805_v60 = vadd.f32 %v2494_v10, %v116_v63  ;;  %v553_v56 = vshll.u32 %v2698_v20, %v2755_v62 }
 0x17d   :  { %v554_v11 = vshrl.u32 %v536_v24, %v552_v28  ;;  %v749_v26 = vshll.u32 %v2796_v36, 30  ;;  %v797_v58 = vor.u32 8388608, %v796_v40  ;;  %v802_v44 = vshrl.u32 %v801_v51, 5 }
 0x17e   :  { %v804_v59 = vsub.s32 32, %v803_v31  ;;  %v806_v1 = vshll.u32 %v2374_v32, %v803_v31  ;;  %v809_v3 = vshll.u32 %v2375_v34, %v803_v31  ;;  %v558_v4 = vshll.u32 %v557_v19, 23 }
 0x17f   :  { %v2812_v5 = vsub.s32 %v746_v30, %v749_v26  ;;  %v812_v10 = vshll.u32 %v2376_v39, %v803_v31  ;;  %v815_v63 = vshll.u32 %v3236_v41, %v803_v31  ;;  %v818_v17 = vshll.u32 %v2378_v43, %v803_v31 }
 0x180   :  { %v807_v6 = vshrl.u32 %v2375_v34, %v804_v59  ;;  %v810_v20 = vshrl.u32 %v2376_v39, %v804_v59  ;;  %v813_v46 = vshrl.u32 %v3236_v41, %v804_v59  ;;  %v816_v55 = vshrl.u32 %v2378_v43, %v804_v59 }
 0x181   :  { %v752_v62 = vsub.s32 0, %v2812_v5  ;;  %v819_v33 = vshrl.u32 %v2379_v54, %v804_v59  ;;  %v998_v9 = vand.u32 2139095040, %v2805_v60  ;;  %vm821_vm1 = vcmp.lt.s32.totalorder %v802_v44, 1 }
 0x182   :  { %v808_v25 = vor.u32 %v807_v6, %v806_v1  ;;  %v811_v30 = vor.u32 %v810_v20, %v809_v3  ;;  %v2824_v47 = vshll.u32 %v797_v58, 8  ;;  %v559_v53 = vor.u32 4788187, %v558_v4 }
 0x183   :  { %v1932_v52 = vmin.u32 %v752_v62, %v2812_v5  ;;  %v814_v13 = vor.u32 %v813_v46, %v812_v10  ;;  %v817_v27 = vor.u32 %v816_v55, %v815_v63  ;;  %v805_v28 = vshrl.u32 %v2374_v32, %v804_v59 }
 0x184   :  { %v820_v42 = vor.u32 %v819_v33, %v818_v17  ;;  %vm823_vm2 = vcmp.lt.s32.totalorder %v802_v44, 3  ;;  %vm824_vm3 = vcmp.lt.s32.totalorder %v802_v44, 4  ;;  %vm822_vm4 = vcmp.lt.s32.totalorder %v802_v44, 2 }
 0x185   :  { %v754_v40 = vclz %v1932_v52  ;;  %v826_v24 = vsel %vm824_vm3, %v814_v13, 2102212464  ;;  %v829_v19 = vsel %vm821_vm1, %v808_v25, %v811_v30  ;;  %v2830_v51 = vpop.eup %2215  ;;  %v555_v31 = vor.u32 %v554_v11, %v553_v56 }
 0x186   :  { %v830_v26 = vsel %vm824_vm3, %v817_v27, 920167782  ;;  %v3234_v58 = vand.u32 2147483647, %v2805_v60  ;;  %v999_v1 = vshrl.u32 %v998_v9, 23  ;;  %v833_v10 = vsel %vm821_vm1, %v811_v30, %v814_v13 }
 0x187   :  { %v560_v3 = vand.u32 2147483647, %v559_v53  ;;  %v1933_v4 = vadd.s32 4294967294, %v754_v40  ;;  %v831_v59 = vsel %vm823_vm2, %v814_v13, %v830_v26  ;;  %v825_v63 = vsel %vm821_vm1, %v805_v28, %v808_v25 }
 0x188   :  { %v827_v6 = vsel %vm823_vm2, %v811_v30, %v826_v24  ;;  %v832_v20 = vsel %vm822_vm4, %v829_v19, %v831_v59  ;;  %v834_v46 = vsel %vm824_vm3, %v820_v42, 1326507024  ;;  %v562_v62 = vcvt.s32.f32 %v555_v31 }
 0x189   :  { %vm1934_vm5 = vcmp.lt.s32.totalorder %v1933_v4, 0  ;;  %v835_v56 = vsel %vm823_vm2, %v817_v27, %v834_v46  ;;  %v2842_v11 = vmul.u32.u64.low %v2824_v47, %v832_v20  ;;  %v2843_v17 = vmul.u32.u64.high %v2824_v47, %v832_v20, %v2842_v11 }
 0x18a   :  { %v757_v55 = vsel %vm1934_vm5, 0, %v1933_v4  ;;  %v836_v33 = vsel %vm822_vm4, %v833_v10, %v835_v56  ;;  %v1943_v9 = vadd.s32 4294967169, %v999_v1  ;;  %v828_v30 = vsel %vm822_vm4, %v825_v63, %v827_v6 }
 0x18b   :  { %v758_v25 = vsub.s32 32, %v757_v55  ;;  %v762_v53 = vsub.s32 4294967266, %v757_v55  ;;  %v1002_v52 = vand.u32 8388607, %v3234_v58  ;;  %v2850_v13 = vmul.f32 %v562_v62, %v560_v3 }
 0x18c   :  { %v2853_v27 = vmul.u32.u64.low %v2824_v47, %v836_v33  ;;  %v2854_v28 = vmul.u32.u64.high %v2824_v47, %v836_v33, %v2853_v27  ;;  %v1005_v42 = vadd.s32 1, %v1943_v9  ;;  %v742_v40 = vadd.s32 %v2732_v23, %v2738_v38 }
 0x18d   :  { %v763_v24 = vadd.s32 127, %v762_v53  ;;  %v847_v19 = vadd.s32 1, %v2843_v17  ;;  %v2861_v44 = vadd.f32 %v2496_v14, %v2766_v12  ;;  %2217 = vsinq.f32 %v2771_v21 }
 0x18e   :  { %v844_v31 = vmul.u32 %v2824_v47, %v828_v30  ;;  %vm1006_vm6 = vcmp.gt.s32.totalorder %v1005_v42, 0  ;;  %v2867_v26 = vadd.f32 %v2499_v16, %v2775_v8  ;;  %2219 = vcosq.f32 %v2802_v57 }
 0x18f   :  { %v760_v1 = vshrl.u32 %v742_v40, %v758_v25  ;;  %v764_v23 = vshll.u32 %v763_v24, 23  ;;  %v1007_v38 = vsel %vm1006_vm6, %v1005_v42, 0  ;;  %v564_v3 = vxor.u32 2147483648, %v2850_v13 }
 0x190   :  { %vm846_vm7 = vc.u32 %v2854_v28, %v2842_v11  ;;  %v1003_v14 = vor.u32 8388608, %v1002_v52  ;;  %v1009_v12 = vand.u32 31, %v1007_v38  ;;  %v759_v21 = vshll.u32 %v2812_v5, %v757_v55 }
 0x191   :  { %v765_v47 = vor.u32 4788187, %v764_v23  ;;  %v848_v4 = vsel %vm846_vm7, %v847_v19, %v2843_v17  ;;  %v895_v16 = vand.u32 2139095040, %v2861_v44  ;;  %vm482_vm8 = vcmp.lt.s32.totalorder %v2473_v49, 0 }
 0x192   :  { %v849_v8 = vadd.s32 %v848_v4, %v844_v31  ;;  %v1010_v59 = vsub.s32 32, %v1009_v12  ;;  %v1012_v10 = vshll.u32 %v2374_v32, %v1009_v12  ;;  %v1015_v63 = vshll.u32 %v2375_v34, %v1009_v12 }
 0x193   :  { %v761_v6 = vor.u32 %v760_v1, %v759_v21  ;;  %v766_v20 = vand.u32 2147483647, %v765_v47  ;;  %v1008_v46 = vshrl.u32 %v1007_v38, 5  ;;  %v1021_v56 = vshll.u32 %v3236_v41, %v1009_v12 }
 0x194   :  { %v850_v62 = vadd.s32 536870912, %v849_v8  ;;  %v1013_v5 = vshrl.u32 %v2375_v34, %v1010_v59  ;;  %v1016_v17 = vshrl.u32 %v2376_v39, %v1010_v59  ;;  %v1018_v55 = vshll.u32 %v2376_v39, %v1009_v12 }
 0x195   :  { %v1019_v33 = vshrl.u32 %v3236_v41, %v1010_v59  ;;  %v1022_v9 = vshrl.u32 %v2378_v43, %v1010_v59  ;;  %v1024_v25 = vshll.u32 %v2378_v43, %v1009_v12  ;;  %v1025_v53 = vshrl.u32 %v2379_v54, %v1010_v59 }
 0x196   :  { %vm2889_vm9 = vcmp.le.f32.partialorder %v480_v61, 0.7853982  ;;  %v2893_v52 = vshrl.u32 %v850_v62, 30  ;;  %v1014_v27 = vor.u32 %v1013_v5, %v1012_v10  ;;  %v1017_v42 = vor.u32 %v1016_v17, %v1015_v63 }
 0x197   :  { %v3235_v40 = vand.u32 2147483647, %v2861_v44  ;;  %v768_v24 = vcvt.s32.f32 %v761_v6  ;;  %v1011_v19 = vshrl.u32 %v2374_v32, %v1010_v59  ;;  %v1023_v31 = vor.u32 %v1022_v9, %v1021_v56  ;;  %v2897_v1 = vpop.eup %2217 }
 0x198   :  { %vm1027_vm10 = vcmp.lt.s32.totalorder %v1008_v46, 1  ;;  %vm688_vm11 = vcmp.lt.s32.totalorder %v2486_v2, 0  ;;  %v852_v61 = vshll.u32 %v2893_v52, 30  ;;  %v1020_v23 = vor.u32 %v1019_v33, %v1018_v55  ;;  %v2901_v21 = vpop.eup %2219 }
 0x199   :  { %v1043_v38 = vshll.u32 %v1003_v14, 8  ;;  %v896_v12 = vshrl.u32 %v895_v16, 23  ;;  %v769_v47 = vmul.f32 %v768_v24, %v766_v20  ;;  %v1026_v4 = vor.u32 %v1025_v53, %v1024_v25 }
 0x19a   :  { %vm1029_vm12 = vcmp.lt.s32.totalorder %v1008_v46, 3  ;;  %vm1030_vm0 = vcmp.lt.s32.totalorder %v1008_v46, 4  ;;  %v2903_v10 = vsub.s32 %v849_v8, %v852_v61  ;;  %vm1028_vm1 = vcmp.lt.s32.totalorder %v1008_v46, 2 }
 0x19b   :  { %v1032_v59 = vsel %vm1030_vm0, %v1020_v23, 2102212464  ;;  %v1035_v63 = vsel %vm1027_vm10, %v1014_v27, %v1017_v42  ;;  %v565_v6 = vsel %vm482_vm8, %v564_v3, %v2850_v13  ;;  %vm2912_vm2 = vcmp.le.f32.partialorder %v686_v15, 0.7853982 }
 0x19c   :  { %v1031_v16 = vsel %vm1027_vm10, %v1011_v19, %v1014_v27  ;;  %v1036_v8 = vsel %vm1030_vm0, %v1023_v31, 920167782  ;;  %v899_v20 = vand.u32 8388607, %v3235_v40  ;;  %v855_v56 = vsub.s32 0, %v2903_v10 }
 0x19d   :  { %v1033_v62 = vsel %vm1029_vm12, %v1017_v42, %v1032_v59  ;;  %v1037_v5 = vsel %vm1029_vm12, %v1020_v23, %v1036_v8  ;;  %v1039_v13 = vsel %vm1027_vm10, %v1017_v42, %v1020_v23  ;;  %v770_v3 = vxor.u32 2147483648, %v769_v47 }
 0x19e   :  { %v1038_v15 = vsel %vm1028_vm1, %v1035_v63, %v1037_v5  ;;  %v1040_v17 = vsel %vm1030_vm0, %v1026_v4, 1326507024  ;;  %v1939_v55 = vadd.s32 4294967169, %v896_v12  ;;  %v1936_v33 = vmin.u32 %v855_v56, %v2903_v10 }
 0x19f   :  { %v1041_v9 = vsel %vm1029_vm12, %v1023_v31, %v1040_v17  ;;  %v2928_v25 = vmul.u32.u64.low %v1043_v38, %v1038_v15  ;;  %v2929_v53 = vmul.u32.u64.high %v1043_v38, %v1038_v15, %v2928_v25  ;;  %v2935_v27 = vsel %vm2889_vm9, %v2473_v49, %v565_v6 }
 0x1a0   :  { %v1034_v42 = vsel %vm1028_vm1, %v1031_v16, %v1033_v62  ;;  %v1042_v24 = vsel %vm1028_vm1, %v1039_v13, %v1041_v9  ;;  %v902_v19 = vadd.s32 1, %v1939_v55  ;;  %v857_v61 = vclz %v1936_v33 }
 0x1a1   :  { %v2939_v23 = vmul.u32.u64.low %v1043_v38, %v1042_v24  ;;  %v2940_v12 = vmul.u32.u64.high %v1043_v38, %v1042_v24, %v2939_v23  ;;  %v900_v4 = vor.u32 8388608, %v899_v20  ;;  %2221 = vsinq.f32 %v2802_v57 }
 0x1a2   :  { %v771_v31 = vsel %vm688_vm11, %v770_v3, %v769_v47  ;;  %vm903_vm3 = vcmp.gt.s32.totalorder %v902_v19, 0  ;;  %v1101_v59 = vand.u32 2139095040, %v2867_v26  ;;  %v1937_v63 = vadd.s32 4294967294, %v857_v61 }
 0x1a3   :  { %v1050_v6 = vmul.u32 %v1043_v38, %v1034_v42  ;;  %v1053_v16 = vadd.s32 1, %v2929_v53  ;;  %v904_v46 = vsel %vm903_vm3, %v902_v19, 0  ;;  %2223 = vcosq.f32 %v2935_v27 }
 0x1a4   :  { %v845_v8 = vadd.s32 %v2842_v11, %v2854_v28  ;;  %v906_v56 = vand.u32 31, %v904_v46  ;;  %v1098_v20 = vand.u32 2147483647, %v2867_v26  ;;  %v2954_v57 = vsel %vm2912_vm2, %v2486_v2, %v771_v31 }
 0x1a5   :  { %vm1938_vm4 = vcmp.lt.s32.totalorder %v1937_v63, 0  ;;  %vm1052_vm5 = vc.u32 %v2940_v12, %v2928_v25  ;;  %v2958_v38 = vshll.u32 %v900_v4, 8  ;;  %v1102_v13 = vshrl.u32 %v1101_v59, 23 }
 0x1a6   :  { %v860_v47 = vsel %vm1938_vm4, 0, %v1937_v63  ;;  %v1054_v62 = vsel %vm1052_vm5, %v1053_v16, %v2929_v53  ;;  %v907_v5 = vsub.s32 32, %v906_v56  ;;  %v909_v15 = vshll.u32 %v2374_v32, %v906_v56 }
 0x1a7   :  { %v861_v11 = vsub.s32 32, %v860_v47  ;;  %v865_v28 = vsub.s32 4294967266, %v860_v47  ;;  %v1055_v3 = vadd.s32 %v1054_v62, %v1050_v6  ;;  %v905_v17 = vshrl.u32 %v904_v46, 5 }
 0x1a8   :  { %v910_v55 = vshrl.u32 %v2375_v34, %v907_v5  ;;  %v912_v33 = vshll.u32 %v2375_v34, %v906_v56  ;;  %v913_v9 = vshrl.u32 %v2376_v39, %v907_v5  ;;  %v915_v61 = vshll.u32 %v2376_v39, %v906_v56 }
 0x1a9   :  { %v863_v42 = vshrl.u32 %v845_v8, %v861_v11  ;;  %v866_v24 = vadd.s32 127, %v865_v28  ;;  %v1056_v19 = vadd.s32 536870912, %v1055_v3  ;;  %v862_v53 = vshll.u32 %v2903_v10, %v860_v47 }
 0x1aa   :  { %v908_v23 = vshrl.u32 %v2374_v32, %v907_v5  ;;  %v916_v4 = vshrl.u32 %v3236_v41, %v907_v5  ;;  %v918_v31 = vshll.u32 %v3236_v41, %v906_v56  ;;  %v911_v6 = vor.u32 %v910_v55, %v909_v15 }
 0x1ab   :  { %v867_v59 = vshll.u32 %v866_v24, 23  ;;  %v2970_v63 = vshrl.u32 %v1056_v19, 30  ;;  %v919_v16 = vshrl.u32 %v2378_v43, %v907_v5  ;;  %v2973_v46 = vpop.eup %2221  ;;  %v864_v8 = vor.u32 %v863_v42, %v862_v53 }
 0x1ac   :  { %v914_v62 = vor.u32 %v913_v9, %v912_v33  ;;  %v921_v11 = vshll.u32 %v2378_v43, %v906_v56  ;;  %v922_v10 = vshrl.u32 %v2379_v54, %v907_v5  ;;  %v917_v58 = vor.u32 %v916_v4, %v915_v61 }
 0x1ad   :  { %v868_v47 = vor.u32 4788187, %v867_v59  ;;  %v1058_v28 = vshll.u32 %v2970_v63, 30  ;;  %vm924_vm6 = vcmp.lt.s32.totalorder %v905_v17, 1  ;;  %v2978_v40 = vpop.eup %2223  ;;  %v920_v24 = vor.u32 %v919_v16, %v918_v31 }
 0x1ae   :  { %v923_v19 = vor.u32 %v922_v10, %v921_v11  ;;  %vm926_vm7 = vcmp.lt.s32.totalorder %v905_v17, 3  ;;  %v1947_v15 = vadd.s32 4294967169, %v1102_v13  ;;  %vm925_vm10 = vcmp.lt.s32.totalorder %v905_v17, 2 }
 0x1af   :  { %v869_v55 = vand.u32 2147483647, %v868_v47  ;;  %v2980_v41 = vsub.s32 %v1055_v3, %v1058_v28  ;;  %vm927_vm12 = vcmp.lt.s32.totalorder %v905_v17, 4  ;;  %v928_v56 = vsel %vm924_vm6, %v908_v23, %v911_v6 }
 0x1b0   :  { %v929_v33 = vsel %vm927_vm12, %v917_v58, 2102212464  ;;  %v932_v5 = vsel %vm924_vm6, %v911_v6, %v914_v62  ;;  %v933_v9 = vsel %vm927_vm12, %v920_v24, 920167782  ;;  %v871_v42 = vcvt.s32.f32 %v864_v8 }
 0x1b1   :  { %v1061_v61 = vsub.s32 0, %v2980_v41  ;;  %v930_v53 = vsel %vm926_vm7, %v914_v62, %v929_v33  ;;  %v934_v4 = vsel %vm926_vm7, %v917_v58, %v933_v9  ;;  %v936_v3 = vsel %vm924_vm6, %v914_v62, %v917_v58 }
 0x1b2   :  { %v935_v13 = vsel %vm925_vm10, %v932_v5, %v934_v4  ;;  %v937_v31 = vsel %vm927_vm12, %v923_v19, 1326507024  ;;  %v1105_v59 = vand.u32 8388607, %v1098_v20  ;;  %v872_v23 = vmul.f32 %v871_v42, %v869_v55 }
 0x1b3   :  { %v1944_v16 = vmin.u32 %v1061_v61, %v2980_v41  ;;  %v931_v6 = vsel %vm925_vm10, %v928_v56, %v930_v53  ;;  %v938_v8 = vsel %vm926_vm7, %v920_v24, %v937_v31  ;;  %v1108_v28 = vadd.s32 1, %v1947_v15 }
 0x1b4   :  { %v939_v11 = vsel %vm925_vm10, %v936_v3, %v938_v8  ;;  %v2996_v10 = vmul.u32.u64.low %v2958_v38, %v935_v13  ;;  %v2997_v47 = vmul.u32.u64.high %v2958_v38, %v935_v13, %v2996_v10  ;;  %v566_v55 = vsub.s32 4, %v2688_v22 }
 0x1b5   :  { %v1063_v58 = vclz %v1944_v16  ;;  %v3001_v62 = vmul.u32.u64.low %v2958_v38, %v939_v11  ;;  %v3002_v19 = vmul.u32.u64.high %v2958_v38, %v939_v11, %v3001_v62  ;;  %v3010_v17 = vsel %vm585_vm14, %v669_v18, %v2616_v7 }
 0x1b6   :  { %2225 = vsinq.f32 %v2935_v27  ;;  %v1106_v24 = vor.u32 8388608, %v1105_v59  ;;  %vm1109_vm0 = vcmp.gt.s32.totalorder %v1108_v28, 0  ;;  %v873_v56 = vxor.u32 2147483648, %v872_v23 }
 0x1b7   :  { %v1945_v15 = vadd.s32 4294967294, %v1063_v58  ;;  %v947_v33 = vmul.u32 %v2958_v38, %v931_v6  ;;  %v1110_v5 = vsel %vm1109_vm0, %v1108_v28, 0  ;;  %2227 = vcosq.f32 %v2954_v57 }
 0x1b8   :  { %vm791_vm1 = vcmp.lt.s32.totalorder %v2709_v0, 0  ;;  %v950_v9 = vadd.s32 1, %v2997_v47  ;;  %v1112_v42 = vand.u32 31, %v1110_v5  ;;  %2229 = vsinq.f32 %v2954_v57 }
 0x1b9   :  { %vm1946_vm14 = vcmp.lt.s32.totalorder %v1945_v15, 0  ;;  %vm949_vm3 = vc.u32 %v3002_v19, %v2996_v10  ;;  %v567_v7 = vsel %vm482_vm8, %v566_v55, %v2688_v22  ;;  %v1051_v18 = vadd.s32 %v2928_v25, %v2940_v12 }
 0x1ba   :  { %v1066_v27 = vsel %vm1946_vm14, 0, %v1945_v15  ;;  %v951_v38 = vsel %vm949_vm3, %v950_v9, %v2997_v47  ;;  %v1113_v61 = vsub.s32 32, %v1112_v42  ;;  %v874_v53 = vsel %vm791_vm1, %v873_v56, %v872_v23 }
 0x1bb   :  { %v1071_v4 = vsub.s32 4294967266, %v1066_v27  ;;  %v952_v57 = vadd.s32 %v951_v38, %v947_v33  ;;  %v3028_v13 = vshll.u32 %v1106_v24, 8  ;;  %v1115_v3 = vshll.u32 %v2374_v32, %v1112_v42 }
 0x1bc   :  { %v1116_v31 = vshrl.u32 %v2375_v34, %v1113_v61  ;;  %v1118_v22 = vshll.u32 %v2375_v34, %v1112_v42  ;;  %v1119_v59 = vshrl.u32 %v2376_v39, %v1113_v61  ;;  %vm3036_vm8 = vcmp.le.f32.partialorder %v789_v35, 0.7853982 }
 0x1bd   :  { %v953_v12 = vadd.s32 536870912, %v952_v57  ;;  %v1111_v23 = vshrl.u32 %v1110_v5, 5  ;;  %v1121_v16 = vshll.u32 %v2376_v39, %v1112_v42  ;;  %v569_v6 = vsel %vm2889_vm9, 0, %v567_v7 }
 0x1be   :  { %v1067_v8 = vsub.s32 32, %v1066_v27  ;;  %v1068_v11 = vshll.u32 %v2980_v41, %v1066_v27  ;;  %v3248_v47 = vmov 2102212464   ;;  %v1072_v58 = vadd.s32 127, %v1071_v4 }
 0x1bf   :  { %v1122_v34 = vshrl.u32 %v3248_v47, %v1113_v61  ;;  %v1124_v28 = vshll.u32 %v3248_v47, %v1112_v42  ;;  %v3046_v62 = vshrl.u32 %v953_v12, 30  ;;  %v1114_v35 = vshrl.u32 %v2374_v32, %v1113_v61 }
 0x1c0   :  { %v1125_v55 = vshrl.u32 %v2378_v43, %v1113_v61  ;;  %v2226_v24 = vpop.eup %2225  ;;  %v1117_v56 = vor.u32 %v1116_v31, %v1115_v3  ;;  %v1120_v39 = vor.u32 %v1119_v59, %v1118_v22  ;;  %v1127_v30 = vshll.u32 %v2378_v43, %v1112_v42 }
 0x1c1   :  { %v1128_v15 = vshrl.u32 %v2379_v54, %v1113_v61  ;;  %v955_v41 = vshll.u32 %v3046_v62, 30  ;;  %v1123_v33 = vor.u32 %v1122_v34, %v1121_v16  ;;  %vm1130_vm9 = vcmp.lt.s32.totalorder %v1111_v23, 1  ;;  %v3053_v9 = vpop.eup %2227 }
 0x1c2   :  { %v1126_v5 = vor.u32 %v1125_v55, %v1124_v28  ;;  %v1069_v7 = vshrl.u32 %v1051_v18, %v1067_v8  ;;  %vm1132_vm4 = vcmp.lt.s32.totalorder %v1111_v23, 3  ;;  %vm1133_vm5 = vcmp.lt.s32.totalorder %v1111_v23, 4  ;;  %v3055_v32 = vpop.eup %2229 }
 0x1c3   :  { %v1129_v27 = vor.u32 %v1128_v15, %v1127_v30  ;;  %v1073_v38 = vshll.u32 %v1072_v58, 23  ;;  %v3057_v4 = vsub.s32 %v952_v57, %v955_v41  ;;  %vm1131_vm6 = vcmp.lt.s32.totalorder %v1111_v23, 2 }
 0x1c4   :  { %v1135_v43 = vsel %vm1133_vm5, %v1123_v33, 2102212464  ;;  %v1134_v54 = vsel %vm1130_vm9, %v1114_v35, %v1117_v56  ;;  %v1138_v61 = vsel %vm1130_vm9, %v1117_v56, %v1120_v39  ;;  %v1139_v3 = vsel %vm1133_vm5, %v1126_v5, 920167782 }
 0x1c5   :  { %v1136_v42 = vsel %vm1132_vm4, %v1120_v39, %v1135_v43  ;;  %v958_v18 = vsub.s32 0, %v3057_v4  ;;  %v1140_v31 = vsel %vm1132_vm4, %v1123_v33, %v1139_v3  ;;  %v1142_v22 = vsel %vm1130_vm9, %v1120_v39, %v1123_v33 }
 0x1c6   :  { %v573_v59 = vand.u32 3, %v569_v6  ;;  %v3070_v57 = vsel %vm3036_vm8, %v2709_v0, %v874_v53  ;;  %v3072_v12 = vor.u32 %v1069_v7, %v1068_v11  ;;  %v1141_v16 = vsel %vm1131_vm6, %v1138_v61, %v1140_v31 }
 0x1c7   :  { %v1143_v8 = vsel %vm1133_vm5, %v1129_v27, 1326507024  ;;  %v3076_v47 = vor.u32 4788187, %v1073_v38  ;;  %v1940_v34 = vmin.u32 %v958_v18, %v3057_v4  ;;  %v1137_v28 = vsel %vm1131_vm6, %v1134_v54, %v1136_v42 }
 0x1c8   :  { %v1144_v58 = vsel %vm1132_vm4, %v1126_v5, %v1143_v8  ;;  %v3083_v35 = vmul.u32.u64.low %v3028_v13, %v1141_v16  ;;  %v3084_v53 = vmul.u32.u64.high %v3028_v13, %v1141_v16, %v3083_v35  ;;  %v576_v11 = vxor.u32 2147483648, %v2226_v24 }
 0x1c9   :  { %v1145_v6 = vsel %vm1131_vm6, %v1142_v22, %v1144_v58  ;;  %v960_v55 = vclz %v1940_v34  ;;  %vm575_vm7 = vcmp.eq.s32.totalorder %v573_v59, 0  ;;  %v948_v30 = vadd.s32 %v2996_v10, %v3002_v19 }
 0x1ca   :  { %v3088_v56 = vmul.u32.u64.low %v3028_v13, %v1145_v6  ;;  %v3089_v39 = vmul.u32.u64.high %v3028_v13, %v1145_v6, %v3088_v56  ;;  %vm572_vm10 = vweird.f32 %v2473_v49  ;;  %v577_v23 = vsel %vm575_vm7, %v2978_v40, %v576_v11 }
 0x1cb   :  { %v579_v15 = vxor.u32 2147483648, %v2978_v40  ;;  %v1941_v41 = vadd.s32 4294967294, %v960_v55  ;;  %v1153_v33 = vmul.u32 %v3028_v13, %v1137_v28  ;;  %vm578_vm12 = vcmp.eq.s32.totalorder %v573_v59, 2 }
 0x1cc   :  { %v772_v5 = vsub.s32 4, %v2796_v36  ;;  %v1077_v7 = vcvt.s32.f32 %v3072_v12  ;;  %v1156_v27 = vadd.s32 1, %v3084_v53  ;;  %vm574_vm0 = vcmp.lt.s32.totalorder %v573_v59, 2 }
 0x1cd   :  { %v580_v38 = vsel %vm578_vm12, %v579_v15, %v2226_v24  ;;  %v1075_v10 = vand.u32 2147483647, %v3076_v47  ;;  %vm1942_vm14 = vcmp.lt.s32.totalorder %v1941_v41, 0  ;;  %vm1155_vm3 = vc.u32 %v3089_v39, %v3083_v35 }
 0x1ce   :  { %v581_v19 = vsel %vm574_vm0, %v577_v23, %v580_v38  ;;  %v963_v40 = vsel %vm1942_vm14, 0, %v1941_v41  ;;  %v1157_v43 = vsel %vm1155_vm3, %v1156_v27, %v3084_v53  ;;  %v773_v54 = vsel %vm688_vm11, %v772_v5, %v2796_v36  ;;  %v2185_v27 = vld [vmem:[#allocation8 + $0x100] sm:$0xff]  }
 0x1cf   :  { %v582_v13 = vsel %vm572_vm10, nan, %v581_v19  ;;  %v964_v42 = vsub.s32 32, %v963_v40  ;;  %v968_v61 = vsub.s32 4294967266, %v963_v40  ;;  %v1158_v24 = vadd.s32 %v1157_v43, %v1153_v33 }
 0x1d0   :  { %vm778_vm9 = vweird.f32 %v2486_v2  ;;  %v782_v3 = vxor.u32 2147483648, %v3055_v32  ;;  %v965_v18 = vshll.u32 %v3057_v4, %v963_v40  ;;  %v1202_v31 = vpack.c.bf16 %v582_v13, %v582_v13 }
 0x1d1   :  { %v775_v22 = vsel %vm2912_vm2, 0, %v773_v54  ;;  %v466_v49 = vsel %vm2760_vm13, 0, %v2785_v50  ;;  %v966_v59 = vshrl.u32 %v948_v30, %v964_v42  ;;  %v969_v12 = vadd.s32 127, %v968_v61 }
 0x1d2   :  { %v1159_v36 = vadd.s32 536870912, %v1158_v24  ;;  %v779_v16 = vand.u32 3, %v775_v22  ;;  %1753 = vmatprep.mubr.bf16.mxu0 %v1202_v31  ;;  %v785_v8 = vxor.u32 2147483648, %v3053_v9  ;;  %v470_v47 = vand.u32 3, %v466_v49  ;;  %v2191_v31 = vld [vmem:[#allocation8 + $0x150] sm:$0xff]  }
 0x1d3   :  { %v473_v34 = vxor.u32 2147483648, %v2897_v1  ;;  %v476_v4 = vxor.u32 2147483648, %v2830_v51  ;;  %v967_v28 = vor.u32 %v966_v59, %v965_v18  ;;  %v970_v58 = vshll.u32 %v969_v12, 23 }
 0x1d4   :  { %v3120_v14 = vshrl.u32 %v1159_v36, 30  ;;  %vm780_vm11 = vcmp.lt.s32.totalorder %v779_v16, 2  ;;  %vm894_vm2 = vcmp.lt.s32.totalorder %v2861_v44, 0  ;;  %vm781_vm13 = vcmp.eq.s32.totalorder %v779_v16, 0  ;;  %v2188_v36 = vld [vmem:[#allocation8 + $0x1c8] sm:$0xff]  }
 0x1d5   :  { %vm784_vm4 = vcmp.eq.s32.totalorder %v779_v16, 2  ;;  %vm471_vm5 = vcmp.lt.s32.totalorder %v470_v47, 2  ;;  %vm472_vm6 = vcmp.eq.s32.totalorder %v470_v47, 0  ;;  %v971_v29 = vor.u32 4788187, %v970_v58  ;;  %v2193_v16 = vld [vmem:[#allocation8 + $0x110] sm:$0xff]  }
 0x1d6   :  { %v974_v50 = vcvt.s32.f32 %v967_v28  ;;  %v1161_v6 = vshll.u32 %v3120_v14, 30  ;;  %v783_v53 = vsel %vm781_vm13, %v3053_v9, %v782_v3  ;;  %v786_v11 = vsel %vm784_vm4, %v785_v8, %v3055_v32 }
 0x1d7   :  { %v474_v55 = vsel %vm472_vm6, %v2830_v51, %v473_v34  ;;  %vm475_vm7 = vcmp.eq.s32.totalorder %v470_v47, 2  ;;  %v672_v56 = vsel %vm2789_vm15, 0, %v3010_v17  ;;  %v972_v30 = vand.u32 2147483647, %v971_v29  ;;  %v2195_v47 = vld [vmem:[#allocation8 + $0x158] sm:$0xff]   ;;  %v2190_v29 = vld [vmem:[#allocation8 + $0x188] sm:$0xff]  }
 0x1d8   :  { %v3130_v23 = vsub.s32 %v1158_v24, %v1161_v6  ;;  %v787_v15 = vsel %vm780_vm11, %v783_v53, %v786_v11  ;;  %v477_v41 = vsel %vm475_vm7, %v476_v4, %v2897_v1  ;;  %vm469_vm10 = vweird.f32 %v2469_v45  ;;  %v2187_v45 = vld [vmem:[#allocation8 + $0x148] sm:$0xff]  }
 0x1d9   :  { %v788_v33 = vsel %vm778_vm9, nan, %v787_v15  ;;  %v478_v9 = vsel %vm471_vm5, %v474_v55, %v477_v41  ;;  %v676_v51 = vand.u32 3, %v672_v56  ;;  %v975_v32 = vmul.f32 %v974_v50, %v972_v30  ;;  %v2189_v24 = vld [vmem:[#allocation8 + $0x108] sm:$0xff]   ;;  %v2192_v50 = vld [vmem:[#allocation8 + $0x1d0] sm:$0xff]   ;;  %v2199_v41 = vld [vmem:[#allocation8 + $0x160] sm:$0xff]  }
 0x1da   :  { %v1164_v5 = vsub.s32 0, %v3130_v23  ;;  %v1204_v37 = vpack.c.bf16 %v788_v33, %v788_v33  ;;  %v479_v17 = vsel %vm469_vm10, nan, %v478_v9  ;;  %v1078_v38 = vmul.f32 %v1077_v7, %v1075_v10 }
 0x1db   :  { %v3249_v19 = vand.u32 2147483647, %v2861_v44  ;;  %v1201_v2 = vpack.c.bf16 %v479_v17, %v479_v17  ;;  %v679_v1 = vxor.u32 2147483648, %v2973_v46  ;;  %v976_v43 = vxor.u32 2147483648, %v975_v32 }
 0x1dc   :  { %v1948_v13 = vmin.u32 %v1164_v5, %v3130_v23  ;;  %1793 = vmatprep.mubr.bf16.mxu1 %v1204_v37  ;;  %vm678_vm12 = vcmp.eq.s32.totalorder %v676_v51, 0  ;;  %v682_v54 = vxor.u32 2147483648, %v2901_v21  ;;  %2231 = vcosq.f32 %v3070_v57  ;;  %v2196_v5 = vld [vmem:[#allocation8 + $0x1d8] sm:$0xff]  }
 0x1dd   :  { %vm3141_vm15 = vcmp.le.f32.partialorder %v3249_v19, 0.7853982  ;;  %1754 = vmatmul.mubr.bf16.vlgmr.msra.gmra.mrb[8].mxu0 %v1201_v2  ;;  %vm677_vm0 = vcmp.lt.s32.totalorder %v676_v51, 2  ;;  %v680_v7 = vsel %vm678_vm12, %v2901_v21, %v679_v1  ;;  %vm681_vm14 = vcmp.eq.s32.totalorder %v676_v51, 2  ;;  %v2194_v51 = vld [vmem:[#allocation8 + $0x190] sm:$0xff]   ;;  %v2203_v2 = vld [vmem:[#allocation8 + $0x168] sm:$0xff]  }
 0x1de   :  { %v977_v10 = vsel %vm894_vm2, %v976_v43, %v975_v32  ;;  %v1166_v42 = vclz %v1948_v13  ;;  %v683_v61 = vsel %vm681_vm14, %v682_v54, %v2973_v46  ;;  %2060 = vmatpush3.bf16.msra.mxu0 %v2185_v27  ;;  %v978_v3 = vsub.s32 4, %v3046_v62  ;;  %v2186_v46 = vld [vmem:[#allocation8 + $0x180] sm:$0xff]   ;;  %v2198_v13 = vld [vmem:[#allocation8 + $0x198] sm:$0xff]  }
 0x1df   :  { %2233 = vsinq.f32 %v3070_v57  ;;  %v980_v18 = vsel %vm3141_vm15, %v2861_v44, %v977_v10  ;;  %vm675_vm3 = vweird.f32 %v2471_v48  ;;  %v684_v21 = vsel %vm677_vm0, %v680_v7, %v683_v61  ;;  %2061 = vmatprep.subr.bf16.mxu0 %v2187_v45  ;;  %v2201_v27 = vld [vmem:[#allocation8 + $0x120] sm:$0xff]   ;;  %v2205_v61 = vld [vmem:[#allocation8 + $0x128] sm:$0xff]  }
 0x1e0   :  { %v1079_v22 = vxor.u32 2147483648, %v1078_v38  ;;  %2235 = vcosq.f32 %v980_v18  ;;  %v1949_v49 = vadd.s32 4294967294, %v1166_v42  ;;  %v685_v59 = vsel %vm675_vm3, nan, %v684_v21  ;;  %v2200_v7 = vld [vmem:[#allocation8 + $0x1e0] sm:$0xff]   ;;  %v2207_v21 = vld [vmem:[#allocation8 + $0x170] sm:$0xff]  }
 0x1e1   :  { %2237 = vsinq.f32 %v980_v18  ;;  %v1203_v12 = vpack.c.bf16 %v685_v59, %v685_v59  ;;  %v979_v57 = vsel %vm894_vm2, %v978_v3, %v3046_v62  ;;  %v875_v48 = vsub.s32 4, %v2893_v52  ;;  %v2202_v59 = vld [vmem:[#allocation8 + $0x1a0] sm:$0xff]  }
 0x1e2   :  { %vm1950_vm9 = vcmp.lt.s32.totalorder %v1949_v49, 0  ;;  %2062 = vmatpush3.bf16.msra.mxu0 %v2189_v24  ;;  %vm997_vm11 = vcmp.lt.s32.totalorder %v2805_v60, 0  ;;  %v1154_v4 = vadd.s32 %v3083_v35, %v3089_v39  ;;  %v981_v62 = vsel %vm3141_vm15, 0, %v979_v57  ;;  %v2197_v35 = vld [vmem:[#allocation8 + $0x118] sm:$0xff]   ;;  %v2209_v57 = vld [vmem:[#allocation8 + $0x130] sm:$0xff]  }
 0x1e3   :  { %v1169_v8 = vsel %vm1950_vm9, 0, %v1949_v49  ;;  %1794 = vmatmul.mubr.bf16.vlgmr.msra.gmra.mrb[8].mxu1 %v1203_v12  ;;  %2063 = vmatprep.subr.bf16.mxu0 %v2191_v31  ;;  %v1080_v34 = vsel %vm997_vm11, %v1079_v22, %v1078_v38  ;;  %v3252_v6 = vand.u32 2147483647, %v2805_v60  ;;  %v876_v30 = vsel %vm791_vm1, %v875_v48, %v2893_v52  ;;  %v2204_v12 = vld [vmem:[#allocation8 + $0x1e8] sm:$0xff]  }
 0x1e4   :  { %v1170_v28 = vsub.s32 32, %v1169_v8  ;;  %v1174_v58 = vsub.s32 4294967266, %v1169_v8  ;;  %2082 = vmatpush3.bf16.msra.mxu1 %v2186_v46  ;;  %v1171_v11 = vshll.u32 %v3130_v23, %v1169_v8  ;;  %v985_v23 = vand.u32 3, %v981_v62 }
 0x1e5   :  { %2083 = vmatprep.subr.bf16.mxu1 %v2188_v36  ;;  %vm3172_vm2 = vcmp.le.f32.partialorder %v3252_v6, 0.7853982  ;;  %v878_v52 = vsel %vm3036_vm8, 0, %v876_v30  ;;  %v1081_v19 = vsub.s32 4, %v2970_v63  ;;  %vm984_vm8 = vweird.f32 %v2861_v44  ;;  %v2210_v6 = vld [vmem:[#allocation8 + $0x1b0] sm:$0xff]  }
 0x1e6   :  { %v1172_v55 = vshrl.u32 %v1154_v4, %v1170_v28  ;;  %v1175_v56 = vadd.s32 127, %v1174_v58  ;;  %2064 = vmatpush3.bf16.msra.mxu0 %v2193_v16  ;;  %v3177_v39 = vpop.eup %2231  ;;  %v1083_v15 = vsel %vm3172_vm2, %v2805_v60, %v1080_v34  ;;  %vm990_vm1 = vcmp.eq.s32.totalorder %v985_v23, 2  ;;  %v2206_v34 = vld [vmem:[#allocation8 + $0x1a8] sm:$0xff]   ;;  %v2208_v28 = vld [vmem:[#allocation8 + $0x1f0] sm:$0xff]  }
 0x1e7   :  { %2065 = vmatprep.subr.bf16.mxu0 %v2195_v47  ;;  %2239 = vcosq.f32 %v1083_v15  ;;  %vm986_vm13 = vcmp.lt.s32.totalorder %v985_v23, 2  ;;  %vm987_vm4 = vcmp.eq.s32.totalorder %v985_v23, 0  ;;  %v882_v25 = vand.u32 3, %v878_v52 }
 0x1e8   :  { %v1173_v33 = vor.u32 %v1172_v55, %v1171_v11  ;;  %v1176_v9 = vshll.u32 %v1175_v56, 23  ;;  %2084 = vmatpush3.bf16.msra.mxu1 %v2190_v29  ;;  %2241 = vsinq.f32 %v1083_v15  ;;  %v888_v3 = vxor.u32 2147483648, %v3177_v39 }
 0x1e9   :  { %v2234_v32 = vpop.eup %2233  ;;  %2085 = vmatprep.subr.bf16.mxu1 %v2192_v50  ;;  %vm3192_vm5 = vcmp.le.f32.partialorder %v1098_v20, 0.7853982  ;;  %vm1100_vm6 = vcmp.lt.s32.totalorder %v2867_v26, 0  ;;  %v1082_v46 = vsel %vm997_vm11, %v1081_v19, %v2970_v63  ;;  %vm884_vm7 = vcmp.eq.s32.totalorder %v882_v25, 0  ;;  %v2211_v63 = vld [vmem:[#allocation8 + $0x178] sm:$0xff]  }
 0x1ea   :  { %v2236_v37 = vpop.eup %2235  ;;  %v1177_v17 = vor.u32 4788187, %v1176_v9  ;;  %2066 = vmatpush3.bf16.msra.mxu0 %v2197_v35  ;;  %v1180_v45 = vcvt.s32.f32 %v1173_v33  ;;  %v885_v24 = vxor.u32 2147483648, %v2234_v32  ;;  %vm887_vm10 = vcmp.eq.s32.totalorder %v882_v25, 2  ;;  %v2213_v50 = vld [vmem:[#allocation8 + $0x138] sm:$0xff]  }
 0x1eb   :  { %v2238_v38 = vpop.eup %2237  ;;  %v991_v40 = vxor.u32 2147483648, %v2236_v37  ;;  %2067 = vmatprep.subr.bf16.mxu0 %v2199_v41  ;;  %v1184_v36 = vsub.s32 4, %v3120_v14  ;;  %v889_v48 = vsel %vm887_vm10, %v888_v3, %v2234_v32  ;;  %vm883_vm15 = vcmp.lt.s32.totalorder %v882_v25, 2  ;;  %v2212_v35 = vld [vmem:[#allocation8 + $0x1f8] sm:$0xff]  }
 0x1ec   :  { %v1178_v1 = vand.u32 2147483647, %v1177_v17  ;;  %v988_v43 = vxor.u32 2147483648, %v2238_v38  ;;  %2086 = vmatpush3.bf16.msra.mxu1 %v2194_v51  ;;  %v886_v16 = vsel %vm884_vm7, %v3177_v39, %v885_v24  ;;  %v1084_v29 = vsel %vm3172_vm2, 0, %v1082_v46 }
 0x1ed   :  { %v992_v54 = vsel %vm990_vm1, %v991_v40, %v2238_v38  ;;  %2087 = vmatprep.subr.bf16.mxu1 %v2196_v5  ;;  %v890_v58 = vsel %vm883_vm15, %v886_v16, %v889_v48  ;;  %v1185_v62 = vsel %vm1100_vm6, %v1184_v36, %v3120_v14  ;;  %vm881_vm12 = vweird.f32 %v2709_v0  ;;  %v2214_v14 = vld [vmem:[#allocation8 + $0x1b8] sm:$0xff]  }
 0x1ee   :  { %v1181_v10 = vmul.f32 %v1180_v45, %v1178_v1  ;;  %v989_v42 = vsel %vm987_vm4, %v2236_v37, %v988_v43  ;;  %2068 = vmatpush3.bf16.msra.mxu0 %v2201_v27  ;;  %v891_v11 = vsel %vm881_vm12, nan, %v890_v58  ;;  %v1088_v55 = vand.u32 3, %v1084_v29 }
 0x1ef   :  { %v993_v18 = vsel %vm986_vm13, %v989_v42, %v992_v54  ;;  %2069 = vmatprep.subr.bf16.mxu0 %v2203_v2  ;;  %v1187_v56 = vsel %vm3192_vm5, 0, %v1185_v62  ;;  %v1205_v30 = vpack.c.bf16 %v891_v11, %v891_v11  ;;  %vm1087_vm1 = vweird.f32 %v2805_v60 }
 0x1f0   :  { %v1182_v22 = vxor.u32 2147483648, %v1181_v10  ;;  %v994_v49 = vsel %vm984_vm8, nan, %v993_v18  ;;  %2088 = vmatpush3.bf16.msra.mxu1 %v2198_v13  ;;  %v1191_v15 = vand.u32 3, %v1187_v56  ;;  %vm1090_vm0 = vcmp.eq.s32.totalorder %v1088_v55, 0 }
 0x1f1   :  { %v1206_v44 = vpack.c.bf16 %v994_v49, %v994_v49  ;;  %2089 = vmatprep.subr.bf16.mxu1 %v2200_v7  ;;  %v2240_v47 = vpop.eup %2239  ;;  %vm1093_vm14 = vcmp.eq.s32.totalorder %v1088_v55, 2  ;;  %vm1089_vm3 = vcmp.lt.s32.totalorder %v1088_v55, 2  ;;  %vm1190_vm13 = vweird.f32 %v2867_v26 }
 0x1f2   :  { %v1183_v20 = vsel %vm1100_vm6, %v1182_v22, %v1181_v10  ;;  %2070 = vmatpush3.bf16.msra.mxu0 %v2205_v61  ;;  %v2242_v4 = vpop.eup %2241  ;;  %v1094_v39 = vxor.u32 2147483648, %v2240_v47  ;;  %vm1196_vm9 = vcmp.eq.s32.totalorder %v1191_v15, 2  ;;  %vm1193_vm11 = vcmp.eq.s32.totalorder %v1191_v15, 0 }
 0x1f3   :  { %v1186_v8 = vsel %vm3192_vm5, %v2867_v26, %v1183_v20  ;;  %1833 = vmatprep.mubr.bf16.mxu0 %v1206_v44  ;;  %2071 = vmatprep.subr.bf16.mxu0 %v2207_v21  ;;  %v1091_v53 = vxor.u32 2147483648, %v2242_v4  ;;  %vm1192_vm2 = vcmp.lt.s32.totalorder %v1191_v15, 2 }
 0x1f4   :  { %2243 = vcosq.f32 %v1186_v8  ;;  %2090 = vmatpush3.bf16.msra.mxu1 %v2202_v59  ;;  %v1095_v41 = vsel %vm1093_vm14, %v1094_v39, %v2242_v4 }
 0x1f5   :  { %2245 = vsinq.f32 %v1186_v8  ;;  %2091 = vmatprep.subr.bf16.mxu1 %v2204_v12  ;;  %v1092_v0 = vsel %vm1090_vm0, %v2240_v47, %v1091_v53 }
 0x1f6   :  { %2072 = vmatpush3.bf16.msra.mxu0 %v2209_v57  ;;  %v1096_v32 = vsel %vm1089_vm3, %v1092_v0, %v1095_v41 }
 0x1f7   :  { %2073 = vmatprep.subr.bf16.mxu0 %v2211_v63  ;;  %v1097_v27 = vsel %vm1087_vm1, nan, %v1096_v32 }
 0x1f8   :  { %2092 = vmatpush3.bf16.msra.mxu1 %v2206_v34  ;;  %v1207_v19 = vpack.c.bf16 %v1097_v27, %v1097_v27 }
 0x1f9   :  { %2093 = vmatprep.subr.bf16.mxu1 %v2208_v28 }
 0x1fa   :  { %2074 = vmatpush3.bf16.msra.mxu0 %v2213_v50 }
 0x1fc   :  { %2094 = vmatpush3.bf16.msra.mxu1 %v2210_v6 }
 0x1fd   :  { %2095 = vmatprep.subr.bf16.mxu1 %v2212_v35  ;;  %1834 = vmatmul.mubr.bf16.vlgmr.msra.gmra.mrb[12].mxu0 %v1205_v30 }
 0x1fe   :  { %v2244_v33 = vpop.eup %2243 }
 0x1ff   :  { %v2246_v9 = vpop.eup %2245  ;;  %v1197_v23 = vxor.u32 2147483648, %v2244_v33 }
 0x200   :  { %v1194_v51 = vxor.u32 2147483648, %v2246_v9  ;;  %2096 = vmatpush3.bf16.msra.mxu1 %v2214_v14 }
 0x201   :  { %v1198_v5 = vsel %vm1196_vm9, %v1197_v23, %v2246_v9 }
 0x202   :  { %v1195_v37 = vsel %vm1193_vm11, %v2244_v33, %v1194_v51 }
 0x203   :  { %v1199_v17 = vsel %vm1192_vm2, %v1195_v37, %v1198_v5 }
 0x204   :  { %v1200_v52 = vsel %vm1190_vm13, nan, %v1199_v17 }
 0x205   :  { %v1208_v38 = vpack.c.bf16 %v1200_v52, %v1200_v52 }
 0x207   :  { %1873 = vmatprep.mubr.bf16.mxu1 %v1208_v38 }
 0x208   :  { %1874 = vmatmul.mubr.bf16.vlgmr.msra.gmra.mrb[12].mxu1 %v1207_v19 }
 0x2b0   :  { %v2031_v40 = vpop.f32.mrb[8].mxu0 }
 0x2b1   :  { %v2032_v2 = vpop.f32.mrb[9].mxu0 }
 0x2b2   :  { %v2033_v1 = vadd.f32 %v2032_v2, %v2031_v40  ;;  %v2034_v45 = vpop.f32.mrb[10].mxu0 }
 0x2b3   :  { %v2035_v43 = vpop.f32.mrb[11].mxu0 }
 0x2b6   :  { %v2053_v13 = vpop.f32.mrb[8].mxu1 }
 0x2b7   :  { %v2054_v54 = vpop.f32.mrb[9].mxu1 }
 0x2b8   :  { %v2055_v7 = vadd.f32 %v2054_v54, %v2053_v13  ;;  %v2056_v25 = vpop.f32.mrb[10].mxu1 }
 0x2b9   :  { %v2057_v10 = vpop.f32.mrb[11].mxu1 }
 0x2ba   :  { %v1796_v60 = vadd.f32 %v2055_v7, %v2033_v1 }
 0x2d0   :  { %v2075_v42 = vpop.f32.mrb[12].mxu0 }
 0x2d1   :  { %v2076_v26 = vpop.f32.mrb[13].mxu0 }
 0x2d2   :  { %v2077_v61 = vadd.f32 %v2076_v26, %v2075_v42  ;;  %v2078_v24 = vpop.f32.mrb[14].mxu0 }
 0x2d3   :  { %v2079_v3 = vpop.f32.mrb[15].mxu0 }
 0x2d4   :  { %v1836_v18 = vadd.f32 %v2077_v61, %v1796_v60 }
 0x2db   :  { %v2097_v21 = vpop.f32.mrb[12].mxu1 }
 0x2dc   :  { %v2098_v31 = vpop.f32.mrb[13].mxu1 }
 0x2dd   :  { %v2099_v22 = vadd.f32 %v2098_v31, %v2097_v21  ;;  %v2100_v49 = vpop.f32.mrb[14].mxu1 }
 0x2de   :  { %v2101_v59 = vpop.f32.mrb[15].mxu1 }
 0x2df   :  { %v1876_v46 = vadd.f32 %v2099_v22, %v1836_v18 }
 0x2e1   :  { %1881 = vst [vmem:[#allocation10] sm:$0xff] %v1876_v46 }
 0x2e2   :  { %2346 = shalt.err (!%p2343_p8)
}
 0x2e3   :  { %s2347_s15 = scalar_lea.hbm %s3233_s4, 128 }
 0x2e4   :  { %p2348_p9 = scmp.ne.s32.totalorder %s3233_s4, %s2347_s15  ;;  %p2351_p10 = scmp.lt.u32.totalorder %s2347_s15, %s3233_s4 }
 0x2e6   :  { %p2353_p11 = pnand %p2351_p10, %p2348_p9 }
 0x2e8   :  { %2356 = shalt.err (!%p2353_p11)
}
 0x2e9   :  { %1891 = dma.vmem_to_hbm [thread:$0]  %s1889_s12, 128, %s3233_s4, [#allocation4]  }
 0x2ea   :  { %2363 = dma.done.wait [#allocation4], 128  }
 0x2eb   :  { %2364 = vsyncadd [#allocation4], 4294967168 }
 0x2ec   :  { %1895 = vsyncpa [#allocation3], 1 }
 0x2ed   :  { %1896 = vsyncpa [#allocation6], 1 }
 0x2ee   :  { %1897 = vsyncpa [#allocation9], 1 }
 0x2ef   :  { %1898 = vsyncpa [#allocation4], 1 }

</bundles_post_ra>
